<compile_context>
chip_gen: v6e
topology: v6e:2x2x1
jax: 0.10.0
libtpu: 0.0.40
codegen_flags: <defaults>
</compile_context>

<pallas_src>
import math
from functools import partial

import numpy as np
import jax
import jax.numpy as jnp
from jax.experimental import pallas as pl
from jax.experimental.pallas import tpu as pltpu


# ----------------------------------------------------------------------------
# helpers: head-group / query-tile selection and compiler params
# ----------------------------------------------------------------------------
def _pick_group(BH, max_g=8):
    """Largest divisor of BH <= max_g, preferring >=2 grid steps (v7x megacore)."""
    divs = [g for g in range(1, min(BH, max_g) + 1) if BH % g == 0]
    two_step = [g for g in divs if BH // g >= 2]
    return max(two_step) if two_step else max(divs)


def _pick_q_tile(L_Q, max_tile=512):
    """Tile L_Q for kernel A so big sequences fit v7x's 64 MiB VMEM; lane-aligned."""
    if L_Q <= max_tile:
        return L_Q
    for t in range(max_tile, 127, -128):
        if L_Q % t == 0:
            return t
    return L_Q


def _compiler_params(dim_semantics, f32_block_shapes):
    """Explicit VMEM limit with double-buffering headroom, capped for v7x (64 MiB)."""
    block_bytes = sum(int(np.prod(s)) * 4 for s in f32_block_shapes)
    vmem_limit = int(min(64 * 1024 * 1024,
                         max(32 * 1024 * 1024, 2 * block_bytes + (4 << 20))))
    return pltpu.CompilerParams(dimension_semantics=dim_semantics,
                                vmem_limit_bytes=vmem_limit)


# ----------------------------------------------------------------------------
# Kernel A: sparsity measure M per query (G heads per grid step, TQ query rows)
#   qa/qb : (G, TQ, 2E)   packed queries  [qr|-qi] / [qi|qr]
#   kp    : (G, L_K, 2E)  packed keys     [kr|ki]
#   cnt   : (TQ, L_K)     multiplicity of each key in the per-query random sample
#   m     : (G, 1, TQ)    M = (max_s Re - sum_s Re / L_K) + (max_s Im - sum_s Im / L_K)
# ----------------------------------------------------------------------------
def _prob_m_kernel(qa_ref, qb_ref, kp_ref, cnt_ref, m_ref, *, inv_l_k):
    qa = qa_ref[...]
    qb = qb_ref[...]
    kp = kp_ref[...]
    cnt = cnt_ref[...]

    # full scores on the MXU (packed 2E contraction); sampled stats derived via cnt.
    qk_r = jnp.einsum('gqe,gke->gqk', qa, kp, preferred_element_type=jnp.float32)
    qk_i = jnp.einsum('gqe,gke->gqk', qb, kp, preferred_element_type=jnp.float32)

    not_sampled = jnp.where(cnt > 0.0, 0.0, -1e30)[None, :, :]   # mask for the max
    cnt_b = cnt[None, :, :]                                      # multiplicity for the sum

    m_r = (jnp.max(qk_r + not_sampled, axis=-1)
           - jnp.sum(qk_r * cnt_b, axis=-1) * inv_l_k)
    m_i = (jnp.max(qk_i + not_sampled, axis=-1)
           - jnp.sum(qk_i * cnt_b, axis=-1) * inv_l_k)
    m_ref[...] = (m_r + m_i)[:, None, :]                         # lane-dense (G, 1, TQ)


# ----------------------------------------------------------------------------
# Kernel B: scores, softmax, attn @ V, V-mean context + scatter — fused (G heads/step)
#   qa/qb : (G, u, 2E)    packed gathered Q_reduce
#   kp    : (G, L_K, 2E)  packed keys
#   vr/vi : (G, L_K, E)   values_ft real / imag
#   idx   : (G, 1, u)     top-u query indices per head (int32)
#   ctx   : (G, L_Q, 2E)  context, [real | imag] packed on lanes
# ----------------------------------------------------------------------------
def _attn_ctx_kernel(qa_ref, qb_ref, kp_ref, vr_ref, vi_ref, idx_ref, ctx_ref,
                     *, scale, l_q):
    qa = qa_ref[...]
    qb = qb_ref[...]
    kp = kp_ref[...]
    vr = vr_ref[...]
    vi = vi_ref[...]
    idx = idx_ref[...]

    # NOTE: bf16 inputs (preferred_element_type=f32) would speed these matmuls up on
    # v6e/v7x but is a precision tradeoff vs. the torch reference; kept in f32.
    sr = jnp.einsum('gue,gke->guk', qa, kp,
                    preferred_element_type=jnp.float32) * scale
    si = jnp.einsum('gue,gke->guk', qb, kp,
                    preferred_element_type=jnp.float32) * scale

    def softmax(x):
        x = x - jnp.max(x, axis=-1, keepdims=True)
        e = jnp.exp(x)
        return e * pl.reciprocal(jnp.sum(e, axis=-1, keepdims=True), approx=True)

    ar = softmax(sr)                                             # (G, u, L_K)
    ai = softmax(si)

    upd = jnp.concatenate(
        [jnp.einsum('guk,gke->gue', ar, vr, preferred_element_type=jnp.float32),
         jnp.einsum('guk,gke->gue', ai, vi, preferred_element_type=jnp.float32)],
        axis=-1)                                                 # (G, u, 2E)

    mean_p = jnp.concatenate(
        [jnp.mean(vr, axis=1, keepdims=True),
         jnp.mean(vi, axis=1, keepdims=True)], axis=-1)          # (G, 1, 2E)

    # fused initial-context + scatter: one-hot(L_Q, u) @ upd puts the attention rows in
    # place (MXU), unselected rows get the V-mean — single lane-dense context write.
    g, u = upd.shape[0], upd.shape[1]
    row_ids = jax.lax.broadcasted_iota(jnp.int32, (g, l_q, u), 1)
    onehot = (row_ids == idx).astype(jnp.float32)                # (G, L_Q, u)
    sel = jnp.sum(onehot, axis=-1, keepdims=True)                # (G, L_Q, 1)

    ctx_ref[...] = (jnp.einsum('glu,gue->gle', onehot, upd,
                               preferred_element_type=jnp.float32)
                    + (1.0 - sel) * mean_p)


# ----------------------------------------------------------------------------
# Forward pass (mask_flag=False, output_attention=False, scale=None -> 1/sqrt(D))
# ----------------------------------------------------------------------------
def fourier_prob_attention_forward(queries, keys, values, sample_key,
                                   factor=5, scale=None):
    B, L_Q, H, D = queries.shape
    _, L_K, _, _ = keys.shape
    E = D // 2 + 1
    E2 = 2 * E
    BH = B * H

    # (B, L, H, D) -> (B, H, L, D)
    q = jnp.transpose(queries, (0, 2, 1, 3)).astype(jnp.float32)
    k = jnp.transpose(keys, (0, 2, 1, 3)).astype(jnp.float32)
    v = jnp.transpose(values, (0, 2, 1, 3)).astype(jnp.float32)

    # TODO(synk): rfft/irfft have no Pallas primitive; kept in plain JAX (XLA FFT).
    q_ft = jnp.fft.rfft(q, axis=-1)
    k_ft = jnp.fft.rfft(k, axis=-1)
    v_ft = jnp.fft.rfft(v, axis=-1)

    qr = jnp.real(q_ft).reshape(BH, L_Q, E).astype(jnp.float32)
    qi = jnp.imag(q_ft).reshape(BH, L_Q, E).astype(jnp.float32)
    kr = jnp.real(k_ft).reshape(BH, L_K, E).astype(jnp.float32)
    ki = jnp.imag(k_ft).reshape(BH, L_K, E).astype(jnp.float32)
    vr = jnp.real(v_ft).reshape(BH, L_K, E).astype(jnp.float32)
    vi = jnp.imag(v_ft).reshape(BH, L_K, E).astype(jnp.float32)

    # real/imag packed along the contraction axis (width 2E, single packed K array)
    qp_a = jnp.concatenate([qr, -qi], axis=-1)                   # (BH, L_Q, 2E)
    qp_b = jnp.concatenate([qi, qr], axis=-1)                    # (BH, L_Q, 2E)
    kp = jnp.concatenate([kr, ki], axis=-1)                      # (BH, L_K, 2E)

    U_part = min(factor * math.ceil(math.log(L_K)), L_K)         # sample_k
    u = min(factor * math.ceil(math.log(L_Q)), L_Q)              # n_top

    # random key-sampling indices, shared across (B, H) like torch.randint(L_K, (L_Q, sample_k)),
    # encoded as a multiplicity matrix consumed inside kernel A (no gathered-key tensor).
    index_sample = jax.random.randint(sample_key, (L_Q, U_part), 0, L_K)
    count = jnp.zeros((L_Q, L_K), jnp.float32).at[
        jnp.arange(L_Q)[:, None], index_sample].add(1.0)

    G = _pick_group(BH)
    TQ = _pick_q_tile(L_Q)
    n_qt = L_Q // TQ

    # --- kernel A: sparsity measure M -----------------------------------------------
    m = pl.pallas_call(
        partial(_prob_m_kernel, inv_l_k=1.0 / L_K),
        out_shape=jax.ShapeDtypeStruct((BH, 1, L_Q), jnp.float32),
        grid=(BH // G, n_qt),
        in_specs=[
            pl.BlockSpec((G, TQ, E2), lambda i, j: (i, j, 0)),
            pl.BlockSpec((G, TQ, E2), lambda i, j: (i, j, 0)),
            pl.BlockSpec((G, L_K, E2), lambda i, j: (i, 0, 0)),
            pl.BlockSpec((TQ, L_K), lambda i, j: (j, 0)),
        ],
        out_specs=pl.BlockSpec((G, 1, TQ), lambda i, j: (i, 0, j)),
        compiler_params=_compiler_params(
            ("parallel", "parallel"),
            [(G, TQ, E2), (G, TQ, E2), (G, L_K, E2), (TQ, L_K), (G, 1, TQ),
             (G, TQ, L_K), (G, TQ, L_K)]),
    )(qp_a, qp_b, kp, count)
    m = m.reshape(BH, L_Q)

    # top-u queries per head (set of indices is what matters; gather and one-hot scatter
    # below use the same permutation so order is irrelevant)
    _, m_top = jax.lax.top_k(m, u)                               # (BH, u)
    qra = jnp.take_along_axis(qp_a, m_top[:, :, None], axis=1)   # (BH, u, 2E)
    qrb = jnp.take_along_axis(qp_b, m_top[:, :, None], axis=1)
    m_top_v = m_top.astype(jnp.int32).reshape(BH, 1, u)

    scale_val = float(scale) if scale is not None else 1.0 / math.sqrt(D)

    # --- kernel B: scores, softmax, attn @ V, fused context build --------------------
    ctx_p = pl.pallas_call(
        partial(_attn_ctx_kernel, scale=scale_val, l_q=L_Q),
        out_shape=jax.ShapeDtypeStruct((BH, L_Q, E2), jnp.float32),
        grid=(BH // G,),
        in_specs=[
            pl.BlockSpec((G, u, E2), lambda i: (i, 0, 0)),
            pl.BlockSpec((G, u, E2), lambda i: (i, 0, 0)),
            pl.BlockSpec((G, L_K, E2), lambda i: (i, 0, 0)),
            pl.BlockSpec((G, L_K, E), lambda i: (i, 0, 0)),
            pl.BlockSpec((G, L_K, E), lambda i: (i, 0, 0)),
            pl.BlockSpec((G, 1, u), lambda i: (i, 0, 0)),
        ],
        out_specs=pl.BlockSpec((G, L_Q, E2), lambda i: (i, 0, 0)),
        compiler_params=_compiler_params(
            ("parallel",),
            [(G, u, E2), (G, u, E2), (G, L_K, E2), (G, L_K, E), (G, L_K, E),
             (G, 1, u), (G, L_Q, E2), (G, u, L_K), (G, u, L_K), (G, L_Q, u)]),
    )(qra, qrb, kp, vr, vi, m_top_v)

    ctx = (ctx_p[..., :E] + 1j * ctx_p[..., E:]).reshape(B, H, L_Q, E)
    context = jnp.fft.irfft(ctx, n=D, axis=-1)                   # (B, H, L_Q, D), float32
    return context.astype(queries.dtype), None                   # output_attention=False


if __name__ == "__main__":
    # module hyper-params (small, consistent with the forward pass).
    # NOTE: the module's `self.weights`, `self.index` and dropout are declared in
    # __init__ but never used in forward(), so they are omitted here.
    B, L, H, D = 2, 16, 4, 16
    factor = 5

    key = jax.random.PRNGKey(0)
    kq, kk, kv, ks = jax.random.split(key, 4)
    queries = jax.random.normal(kq, (B, L, H, D), dtype=jnp.float32)
    keys = jax.random.normal(kk, (B, L, H, D), dtype=jnp.float32)
    values = jax.random.normal(kv, (B, L, H, D), dtype=jnp.float32)

    fwd = jax.jit(partial(fourier_prob_attention_forward, factor=factor))
    context, attn = fwd(queries, keys, values, ks)
    context = jax.block_until_ready(context)

    assert context.shape == (B, H, L, D)
    assert context.dtype == jnp.float32
    assert attn is None
    assert bool(jnp.all(jnp.isfinite(context)))
    print("KERNEL_OK")
</pallas_src>

<mosaic_0001>
module attributes {stable_mosaic.version = 11 : i64} {
  func.func private @main(%arg0: i32) attributes {dimension_semantics = [#tpu.dimension_semantics<core_parallel>], iteration_bounds = array<i64: 2>, tpu.core_type = #tpu.core_type<sc_scalar_subcore>, window_params = []} {
    return
  }
}

module attributes {stable_mosaic.version = 11 : i64} {
  func.func private @main(%arg0: i32) attributes {dimension_semantics = [#tpu.dimension_semantics<core_parallel>], iteration_bounds = array<i64: 2>, tpu.core_type = #tpu.core_type<sc_scalar_subcore>, window_params = []} {
    return
  }
}

module attributes {stable_mosaic.version = 11 : i64} {
  func.func @_prob_m_kernel(%arg0: i32, %arg1: i32, %arg2: memref<4x16x18xf32, #tpu.memory_space<vmem>>, %arg3: memref<4x16x18xf32, #tpu.memory_space<vmem>>, %arg4: memref<4x16x18xf32, #tpu.memory_space<vmem>>, %arg5: memref<16x16xf32, #tpu.memory_space<vmem>>, %arg6: memref<4x1x16xf32, #tpu.memory_space<vmem>>) attributes {dimension_semantics = [#tpu.dimension_semantics<parallel>, #tpu.dimension_semantics<parallel>], iteration_bounds = array<i64: 2, 1>, scalar_prefetch = 0 : i64, scratch_operands = 0 : i64, tpu.core_type = #tpu.core_type<tc>, window_params = [{transform_indices = @transform_0, window_bounds = array<i64: 4, 16, 18>}, {transform_indices = @transform_1, window_bounds = array<i64: 4, 16, 18>}, {transform_indices = @transform_2, window_bounds = array<i64: 4, 16, 18>}, {transform_indices = @transform_3, window_bounds = array<i64: 16, 16>}, {transform_indices = @transform_4, window_bounds = array<i64: 4, 1, 16>}]} {
    %c0 = arith.constant 0 : index
    %c0_0 = arith.constant 0 : index
    %c0_1 = arith.constant 0 : index
    %0 = vector.load %arg2[%c0, %c0_0, %c0_1] : memref<4x16x18xf32, #tpu.memory_space<vmem>>, vector<4x16x18xf32>
    %c0_2 = arith.constant 0 : index
    %c0_3 = arith.constant 0 : index
    %c0_4 = arith.constant 0 : index
    %1 = vector.load %arg3[%c0_2, %c0_3, %c0_4] : memref<4x16x18xf32, #tpu.memory_space<vmem>>, vector<4x16x18xf32>
    %c0_5 = arith.constant 0 : index
    %c0_6 = arith.constant 0 : index
    %c0_7 = arith.constant 0 : index
    %2 = vector.load %arg4[%c0_5, %c0_6, %c0_7] : memref<4x16x18xf32, #tpu.memory_space<vmem>>, vector<4x16x18xf32>
    %c0_8 = arith.constant 0 : index
    %c0_9 = arith.constant 0 : index
    %3 = vector.load %arg5[%c0_8, %c0_9] : memref<16x16xf32, #tpu.memory_space<vmem>>, vector<16x16xf32>
    "tpu.trace_start"() <{level = 10 : i32, message = "gqe,gke->gqk"}> : () -> ()
    %cst = arith.constant dense<0.000000e+00> : vector<4x16x16xf32>
    %4 = tpu.matmul %0, %2, %cst {dimension_numbers = #tpu.dot_dimension_numbers<[2], [2], [1], [1], [0, 0, 0, 1, 1, 1], [0], [0]>} : vector<4x16x18xf32>, vector<4x16x18xf32>, vector<4x16x16xf32> -> vector<4x16x16xf32>
    %cst_10 = arith.constant dense<0.000000e+00> : vector<4x16x16xf32>
    %5 = tpu.matmul %1, %2, %cst_10 {dimension_numbers = #tpu.dot_dimension_numbers<[2], [2], [1], [1], [0, 0, 0, 1, 1, 1], [0], [0]>} : vector<4x16x18xf32>, vector<4x16x18xf32>, vector<4x16x16xf32> -> vector<4x16x16xf32>
    %cst_11 = arith.constant 0.000000e+00 : f32
    "tpu.trace_stop"() : () -> ()
    %6 = vector.broadcast %cst_11 : f32 to vector<16x16xf32>
    %7 = arith.cmpf ogt, %3, %6 : vector<16x16xf32>
    %cst_12 = arith.constant 0.000000e+00 : f32
    %cst_13 = arith.constant -1.000000e+30 : f32
    %8 = vector.broadcast %cst_12 : f32 to vector<16x16xf32>
    %9 = vector.broadcast %cst_13 : f32 to vector<16x16xf32>
    %10 = arith.select %7, %8, %9 : vector<16x16xi1>, vector<16x16xf32>
    %11 = vector.shape_cast %10 : vector<16x16xf32> to vector<1x16x16xf32>
    %12 = vector.shape_cast %3 : vector<16x16xf32> to vector<1x16x16xf32>
    %13 = vector.broadcast %11 : vector<1x16x16xf32> to vector<4x16x16xf32>
    %14 = arith.addf %4, %13 : vector<4x16x16xf32>
    %cst_14 = arith.constant dense<0xFF800000> : vector<4x16xf32>
    %15 = vector.multi_reduction <maximumf>, %14, %cst_14 [2] : vector<4x16x16xf32> to vector<4x16xf32>
    %16 = vector.broadcast %12 : vector<1x16x16xf32> to vector<4x16x16xf32>
    %17 = arith.mulf %4, %16 : vector<4x16x16xf32>
    %cst_15 = arith.constant dense<0.000000e+00> : vector<4x16xf32>
    %18 = vector.multi_reduction <add>, %17, %cst_15 [2] : vector<4x16x16xf32> to vector<4x16xf32>
    %cst_16 = arith.constant 6.250000e-02 : f32
    %19 = vector.broadcast %cst_16 : f32 to vector<4x16xf32>
    %20 = arith.mulf %18, %19 : vector<4x16xf32>
    %21 = arith.subf %15, %20 : vector<4x16xf32>
    %22 = vector.broadcast %11 : vector<1x16x16xf32> to vector<4x16x16xf32>
    %23 = arith.addf %5, %22 : vector<4x16x16xf32>
    %cst_17 = arith.constant dense<0xFF800000> : vector<4x16xf32>
    %24 = vector.multi_reduction <maximumf>, %23, %cst_17 [2] : vector<4x16x16xf32> to vector<4x16xf32>
    %25 = vector.broadcast %12 : vector<1x16x16xf32> to vector<4x16x16xf32>
    %26 = arith.mulf %5, %25 : vector<4x16x16xf32>
    %cst_18 = arith.constant dense<0.000000e+00> : vector<4x16xf32>
    %27 = vector.multi_reduction <add>, %26, %cst_18 [2] : vector<4x16x16xf32> to vector<4x16xf32>
    %cst_19 = arith.constant 6.250000e-02 : f32
    %28 = vector.broadcast %cst_19 : f32 to vector<4x16xf32>
    %29 = arith.mulf %27, %28 : vector<4x16xf32>
    %30 = arith.subf %24, %29 : vector<4x16xf32>
    %31 = arith.addf %21, %30 : vector<4x16xf32>
    %32 = vector.shape_cast %31 : vector<4x16xf32> to vector<4x1x16xf32>
    %c0_20 = arith.constant 0 : index
    %c0_21 = arith.constant 0 : index
    %c0_22 = arith.constant 0 : index
    %33 = vector.load %arg6[%c0_20, %c0_21, %c0_22] : memref<4x1x16xf32, #tpu.memory_space<vmem>>, vector<4x1x16xf32>
    tpu.vector_store %arg6[%c0_20, %c0_21, %c0_22], %32 {strides = array<i32>} : memref<4x1x16xf32, #tpu.memory_space<vmem>>, vector<4x1x16xf32>,
    return
  }
  func.func @transform_0(%arg0: i32, %arg1: i32) -> (i32, i32, i32) {
    %c0_i32 = arith.constant 0 : i32
    %c0_i32_0 = arith.constant 0 : i32
    return %arg0, %arg1, %c0_i32 : i32, i32, i32
  }
  func.func @transform_1(%arg0: i32, %arg1: i32) -> (i32, i32, i32) {
    %c0_i32 = arith.constant 0 : i32
    %c0_i32_0 = arith.constant 0 : i32
    return %arg0, %arg1, %c0_i32 : i32, i32, i32
  }
  func.func @transform_2(%arg0: i32, %arg1: i32) -> (i32, i32, i32) {
    %c0_i32 = arith.constant 0 : i32
    %c0_i32_0 = arith.constant 0 : i32
    %c0_i32_1 = arith.constant 0 : i32
    return %arg0, %c0_i32, %c0_i32_0 : i32, i32, i32
  }
  func.func @transform_3(%arg0: i32, %arg1: i32) -> (i32, i32) {
    %c0_i32 = arith.constant 0 : i32
    %c0_i32_0 = arith.constant 0 : i32
    return %arg1, %c0_i32 : i32, i32
  }
  func.func @transform_4(%arg0: i32, %arg1: i32) -> (i32, i32, i32) {
    %c0_i32 = arith.constant 0 : i32
    %c0_i32_0 = arith.constant 0 : i32
    return %arg0, %c0_i32, %arg1 : i32, i32, i32
  }
}

module attributes {stable_mosaic.version = 11 : i64} {
  func.func @_attn_ctx_kernel(%arg0: i32, %arg1: memref<4x15x18xf32, #tpu.memory_space<vmem>>, %arg2: memref<4x15x18xf32, #tpu.memory_space<vmem>>, %arg3: memref<4x16x18xf32, #tpu.memory_space<vmem>>, %arg4: memref<4x16x9xf32, #tpu.memory_space<vmem>>, %arg5: memref<4x16x9xf32, #tpu.memory_space<vmem>>, %arg6: memref<4x1x15xi32, #tpu.memory_space<vmem>>, %arg7: memref<4x16x18xf32, #tpu.memory_space<vmem>>) attributes {dimension_semantics = [#tpu.dimension_semantics<parallel>], iteration_bounds = array<i64: 2>, scalar_prefetch = 0 : i64, scratch_operands = 0 : i64, tpu.core_type = #tpu.core_type<tc>, window_params = [{transform_indices = @transform_0, window_bounds = array<i64: 4, 15, 18>}, {transform_indices = @transform_1, window_bounds = array<i64: 4, 15, 18>}, {transform_indices = @transform_2, window_bounds = array<i64: 4, 16, 18>}, {transform_indices = @transform_3, window_bounds = array<i64: 4, 16, 9>}, {transform_indices = @transform_4, window_bounds = array<i64: 4, 16, 9>}, {transform_indices = @transform_5, window_bounds = array<i64: 4, 1, 15>}, {transform_indices = @transform_6, window_bounds = array<i64: 4, 16, 18>}]} {
    %c0 = arith.constant 0 : index
    %c0_0 = arith.constant 0 : index
    %c0_1 = arith.constant 0 : index
    %0 = vector.load %arg1[%c0, %c0_0, %c0_1] : memref<4x15x18xf32, #tpu.memory_space<vmem>>, vector<4x15x18xf32>
    %c0_2 = arith.constant 0 : index
    %c0_3 = arith.constant 0 : index
    %c0_4 = arith.constant 0 : index
    %1 = vector.load %arg2[%c0_2, %c0_3, %c0_4] : memref<4x15x18xf32, #tpu.memory_space<vmem>>, vector<4x15x18xf32>
    %c0_5 = arith.constant 0 : index
    %c0_6 = arith.constant 0 : index
    %c0_7 = arith.constant 0 : index
    %2 = vector.load %arg3[%c0_5, %c0_6, %c0_7] : memref<4x16x18xf32, #tpu.memory_space<vmem>>, vector<4x16x18xf32>
    %c0_8 = arith.constant 0 : index
    %c0_9 = arith.constant 0 : index
    %c0_10 = arith.constant 0 : index
    %3 = vector.load %arg4[%c0_8, %c0_9, %c0_10] : memref<4x16x9xf32, #tpu.memory_space<vmem>>, vector<4x16x9xf32>
    %c0_11 = arith.constant 0 : index
    %c0_12 = arith.constant 0 : index
    %c0_13 = arith.constant 0 : index
    %4 = vector.load %arg5[%c0_11, %c0_12, %c0_13] : memref<4x16x9xf32, #tpu.memory_space<vmem>>, vector<4x16x9xf32>
    %c0_14 = arith.constant 0 : index
    %c0_15 = arith.constant 0 : index
    %c0_16 = arith.constant 0 : index
    %5 = vector.load %arg6[%c0_14, %c0_15, %c0_16] : memref<4x1x15xi32, #tpu.memory_space<vmem>>, vector<4x1x15xi32>
    "tpu.trace_start"() <{level = 10 : i32, message = "gue,gke->guk"}> : () -> ()
    %cst = arith.constant dense<0.000000e+00> : vector<4x15x16xf32>
    %6 = tpu.matmul %0, %2, %cst {dimension_numbers = #tpu.dot_dimension_numbers<[2], [2], [1], [1], [0, 0, 0, 1, 1, 1], [0], [0]>} : vector<4x15x18xf32>, vector<4x16x18xf32>, vector<4x15x16xf32> -> vector<4x15x16xf32>
    "tpu.trace_stop"() : () -> ()
    %cst_17 = arith.constant 2.500000e-01 : f32
    %7 = vector.broadcast %cst_17 : f32 to vector<4x15x16xf32>
    %8 = arith.mulf %6, %7 : vector<4x15x16xf32>
    "tpu.trace_start"() <{level = 10 : i32, message = "gue,gke->guk"}> : () -> ()
    %cst_18 = arith.constant dense<0.000000e+00> : vector<4x15x16xf32>
    %9 = tpu.matmul %1, %2, %cst_18 {dimension_numbers = #tpu.dot_dimension_numbers<[2], [2], [1], [1], [0, 0, 0, 1, 1, 1], [0], [0]>} : vector<4x15x18xf32>, vector<4x16x18xf32>, vector<4x15x16xf32> -> vector<4x15x16xf32>
    "tpu.trace_stop"() : () -> ()
    %cst_19 = arith.constant 2.500000e-01 : f32
    %10 = vector.broadcast %cst_19 : f32 to vector<4x15x16xf32>
    %11 = arith.mulf %9, %10 : vector<4x15x16xf32>
    %cst_20 = arith.constant dense<0xFF800000> : vector<4x15xf32>
    %12 = vector.multi_reduction <maximumf>, %8, %cst_20 [2] : vector<4x15x16xf32> to vector<4x15xf32>
    %13 = vector.shape_cast %12 : vector<4x15xf32> to vector<4x15x1xf32>
    %14 = vector.broadcast %13 : vector<4x15x1xf32> to vector<4x15x16xf32>
    %15 = arith.subf %8, %14 : vector<4x15x16xf32>
    %16 = math.exp %15 : vector<4x15x16xf32>
    %cst_21 = arith.constant dense<0.000000e+00> : vector<4x15xf32>
    %17 = vector.multi_reduction <add>, %16, %cst_21 [2] : vector<4x15x16xf32> to vector<4x15xf32>
    %18 = vector.shape_cast %17 : vector<4x15xf32> to vector<4x15x1xf32>
    %19 = tpu.reciprocal %18 {approx = true} : vector<4x15x1xf32> -> vector<4x15x1xf32>
    %20 = vector.broadcast %19 : vector<4x15x1xf32> to vector<4x15x16xf32>
    %21 = arith.mulf %16, %20 : vector<4x15x16xf32>
    %cst_22 = arith.constant dense<0xFF800000> : vector<4x15xf32>
    %22 = vector.multi_reduction <maximumf>, %11, %cst_22 [2] : vector<4x15x16xf32> to vector<4x15xf32>
    %23 = vector.shape_cast %22 : vector<4x15xf32> to vector<4x15x1xf32>
    %24 = vector.broadcast %23 : vector<4x15x1xf32> to vector<4x15x16xf32>
    %25 = arith.subf %11, %24 : vector<4x15x16xf32>
    %26 = math.exp %25 : vector<4x15x16xf32>
    %cst_23 = arith.constant dense<0.000000e+00> : vector<4x15xf32>
    %27 = vector.multi_reduction <add>, %26, %cst_23 [2] : vector<4x15x16xf32> to vector<4x15xf32>
    %28 = vector.shape_cast %27 : vector<4x15xf32> to vector<4x15x1xf32>
    %29 = tpu.reciprocal %28 {approx = true} : vector<4x15x1xf32> -> vector<4x15x1xf32>
    %30 = vector.broadcast %29 : vector<4x15x1xf32> to vector<4x15x16xf32>
    %31 = arith.mulf %26, %30 : vector<4x15x16xf32>
    "tpu.trace_start"() <{level = 10 : i32, message = "guk,gke->gue"}> : () -> ()
    %cst_24 = arith.constant dense<0.000000e+00> : vector<4x15x9xf32>
    %32 = tpu.matmul %21, %3, %cst_24 {dimension_numbers = #tpu.dot_dimension_numbers<[2], [1], [1], [2], [0, 0, 0, 1, 1, 2], [0], [0]>} : vector<4x15x16xf32>, vector<4x16x9xf32>, vector<4x15x9xf32> -> vector<4x15x9xf32>
    %cst_25 = arith.constant dense<0.000000e+00> : vector<4x15x9xf32>
    %33 = tpu.matmul %31, %4, %cst_25 {dimension_numbers = #tpu.dot_dimension_numbers<[2], [1], [1], [2], [0, 0, 0, 1, 1, 2], [0], [0]>} : vector<4x15x16xf32>, vector<4x16x9xf32>, vector<4x15x9xf32> -> vector<4x15x9xf32>
    "tpu.trace_stop"() : () -> ()
    %34 = tpu.concatenate %32, %33 in 2 : vector<4x15x9xf32>, vector<4x15x9xf32> -> vector<4x15x18xf32>
    %cst_26 = arith.constant dense<0.000000e+00> : vector<4x9xf32>
    %35 = vector.multi_reduction <add>, %3, %cst_26 [1] : vector<4x16x9xf32> to vector<4x9xf32>
    %36 = vector.shape_cast %35 : vector<4x9xf32> to vector<4x1x9xf32>
    %cst_27 = arith.constant 1.600000e+01 : f32
    %37 = vector.broadcast %cst_27 : f32 to vector<4x1x9xf32>
    %38 = arith.divf %36, %37 : vector<4x1x9xf32>
    %cst_28 = arith.constant dense<0.000000e+00> : vector<4x9xf32>
    %39 = vector.multi_reduction <add>, %4, %cst_28 [1] : vector<4x16x9xf32> to vector<4x9xf32>
    %40 = vector.shape_cast %39 : vector<4x9xf32> to vector<4x1x9xf32>
    %cst_29 = arith.constant 1.600000e+01 : f32
    %41 = vector.broadcast %cst_29 : f32 to vector<4x1x9xf32>
    %42 = arith.divf %40, %41 : vector<4x1x9xf32>
    %43 = tpu.concatenate %38, %42 in 2 : vector<4x1x9xf32>, vector<4x1x9xf32> -> vector<4x1x18xf32>
    %44 = tpu.iota {dimensions = array<i32: 1>} : vector<4x16x15xi32>
    %45 = vector.broadcast %5 : vector<4x1x15xi32> to vector<4x16x15xi32>
    %46 = arith.cmpi eq, %44, %45 : vector<4x16x15xi32>
    %47 = arith.extui %46 : vector<4x16x15xi1> to vector<4x16x15xi32>
    %48 = arith.sitofp %47 : vector<4x16x15xi32> to vector<4x16x15xf32>
    %cst_30 = arith.constant dense<0.000000e+00> : vector<4x16xf32>
    %49 = vector.multi_reduction <add>, %48, %cst_30 [2] : vector<4x16x15xf32> to vector<4x16xf32>
    %50 = vector.shape_cast %49 : vector<4x16xf32> to vector<4x16x1xf32>
    "tpu.trace_start"() <{level = 10 : i32, message = "glu,gue->gle"}> : () -> ()
    %cst_31 = arith.constant dense<0.000000e+00> : vector<4x16x18xf32>
    %51 = tpu.matmul %48, %34, %cst_31 {dimension_numbers = #tpu.dot_dimension_numbers<[2], [1], [1], [2], [0, 0, 0, 1, 1, 2], [0], [0]>} : vector<4x16x15xf32>, vector<4x15x18xf32>, vector<4x16x18xf32> -> vector<4x16x18xf32>
    "tpu.trace_stop"() : () -> ()
    %cst_32 = arith.constant 1.000000e+00 : f32
    %52 = vector.broadcast %cst_32 : f32 to vector<4x16x1xf32>
    %53 = arith.subf %52, %50 : vector<4x16x1xf32>
    %54 = vector.broadcast %53 : vector<4x16x1xf32> to vector<4x16x18xf32>
    %55 = vector.broadcast %43 : vector<4x1x18xf32> to vector<4x16x18xf32>
    %56 = arith.mulf %54, %55 : vector<4x16x18xf32>
    %57 = arith.addf %51, %56 : vector<4x16x18xf32>
    %c0_33 = arith.constant 0 : index
    %c0_34 = arith.constant 0 : index
    %c0_35 = arith.constant 0 : index
    %58 = vector.load %arg7[%c0_33, %c0_34, %c0_35] : memref<4x16x18xf32, #tpu.memory_space<vmem>>, vector<4x16x18xf32>
    tpu.vector_store %arg7[%c0_33, %c0_34, %c0_35], %57 {strides = array<i32>} : memref<4x16x18xf32, #tpu.memory_space<vmem>>, vector<4x16x18xf32>,
    return
  }
  func.func @transform_0(%arg0: i32) -> (i32, i32, i32) {
    %c0_i32 = arith.constant 0 : i32
    %c0_i32_0 = arith.constant 0 : i32
    %c0_i32_1 = arith.constant 0 : i32
    return %arg0, %c0_i32, %c0_i32_0 : i32, i32, i32
  }
  func.func @transform_1(%arg0: i32) -> (i32, i32, i32) {
    %c0_i32 = arith.constant 0 : i32
    %c0_i32_0 = arith.constant 0 : i32
    %c0_i32_1 = arith.constant 0 : i32
    return %arg0, %c0_i32, %c0_i32_0 : i32, i32, i32
  }
  func.func @transform_2(%arg0: i32) -> (i32, i32, i32) {
    %c0_i32 = arith.constant 0 : i32
    %c0_i32_0 = arith.constant 0 : i32
    %c0_i32_1 = arith.constant 0 : i32
    return %arg0, %c0_i32, %c0_i32_0 : i32, i32, i32
  }
  func.func @transform_3(%arg0: i32) -> (i32, i32, i32) {
    %c0_i32 = arith.constant 0 : i32
    %c0_i32_0 = arith.constant 0 : i32
    %c0_i32_1 = arith.constant 0 : i32
    return %arg0, %c0_i32, %c0_i32_0 : i32, i32, i32
  }
  func.func @transform_4(%arg0: i32) -> (i32, i32, i32) {
    %c0_i32 = arith.constant 0 : i32
    %c0_i32_0 = arith.constant 0 : i32
    %c0_i32_1 = arith.constant 0 : i32
    return %arg0, %c0_i32, %c0_i32_0 : i32, i32, i32
  }
  func.func @transform_5(%arg0: i32) -> (i32, i32, i32) {
    %c0_i32 = arith.constant 0 : i32
    %c0_i32_0 = arith.constant 0 : i32
    %c0_i32_1 = arith.constant 0 : i32
    return %arg0, %c0_i32, %c0_i32_0 : i32, i32, i32
  }
  func.func @transform_6(%arg0: i32) -> (i32, i32, i32) {
    %c0_i32 = arith.constant 0 : i32
    %c0_i32_0 = arith.constant 0 : i32
    %c0_i32_1 = arith.constant 0 : i32
    return %arg0, %c0_i32, %c0_i32_0 : i32, i32, i32
  }
}

</mosaic_0001>

<bundles_post_ra>
// kernel: neg.1
= control target key start
LH: loop header
LB: loop body
LE: loop exit
PB: predicated region body
PF: predicated region fallthrough
CT: control target
= control target key end

     0   :  { %s264_s0 = inlined_call_operand.vmem [shape: f32[8,16,9], index: 0, kind: input, shape index: {}]   ;;  %s265_s1 = inlined_call_operand.vmem [shape: f32[8,16,9], index: 1, kind: output, shape index: {}]  }
   0x1   :  { %v2_v0 = vld [vmem:[%s264_s0] sm:$0xff]  ;;  %v128_v1 = vld [vmem:[%s264_s0 + $0x10] sm:$0xff]  ;;  %v142_v14 = vld [vmem:[%s264_s0 + $0x8] sm:$0xff] }
   0x2   :  { %v130_v2 = vld [vmem:[%s264_s0 + $0x20] sm:$0xff]  ;;  %v5_v3 = vxor.u32 2147483648, %v2_v0  ;;  %v12_v4 = vxor.u32 2147483648, %v128_v1  ;;  %v132_v6 = vld [vmem:[%s264_s0 + $0x30] sm:$0xff]  ;;  %v68_v17 = vxor.u32 2147483648, %v142_v14  ;;  %v144_v18 = vld [vmem:[%s264_s0 + $0x18] sm:$0xff] }
   0x3   :  { %v20_v5 = vxor.u32 2147483648, %v130_v2  ;;  %v134_v7 = vld [vmem:[%s264_s0 + $0x40] sm:$0xff]  ;;  %v136_v8 = vld [vmem:[%s264_s0 + $0x50] sm:$0xff]  ;;  %v28_v9 = vxor.u32 2147483648, %v132_v6  ;;  %v146_v19 = vld [vmem:[%s264_s0 + $0x28] sm:$0xff]  ;;  %v76_v21 = vxor.u32 2147483648, %v144_v18 }
   0x4   :  { %v36_v10 = vxor.u32 2147483648, %v134_v7  ;;  %v44_v11 = vxor.u32 2147483648, %v136_v8  ;;  %v138_v12 = vld [vmem:[%s264_s0 + $0x60] sm:$0xff]  ;;  %v140_v13 = vld [vmem:[%s264_s0 + $0x70] sm:$0xff]  ;;  %7 = vst [vmem:[%s265_s1] sm:$0xff] %v5_v3  ;;  %129 = vst [vmem:[%s265_s1 + $0x10] sm:$0xff] %v12_v4  ;;  %v84_v22 = vxor.u32 2147483648, %v146_v19 }
   0x5   :  { %131 = vst [vmem:[%s265_s1 + $0x20] sm:$0xff] %v20_v5  ;;  %v52_v15 = vxor.u32 2147483648, %v138_v12  ;;  %v60_v16 = vxor.u32 2147483648, %v140_v13  ;;  %v148_v20 = vld [vmem:[%s264_s0 + $0x38] sm:$0xff]  ;;  %133 = vst [vmem:[%s265_s1 + $0x30] sm:$0xff] %v28_v9  ;;  %v150_v24 = vld [vmem:[%s264_s0 + $0x48] sm:$0xff] }
   0x6   :  { %135 = vst [vmem:[%s265_s1 + $0x40] sm:$0xff] %v36_v10  ;;  %137 = vst [vmem:[%s265_s1 + $0x50] sm:$0xff] %v44_v11  ;;  %v92_v23 = vxor.u32 2147483648, %v148_v20  ;;  %v152_v25 = vld [vmem:[%s264_s0 + $0x58] sm:$0xff]  ;;  %v154_v26 = vld [vmem:[%s264_s0 + $0x68] sm:$0xff]  ;;  %v100_v27 = vxor.u32 2147483648, %v150_v24 }
   0x7   :  { %139 = vst [vmem:[%s265_s1 + $0x60] sm:$0xff] %v52_v15  ;;  %141 = vst [vmem:[%s265_s1 + $0x70] sm:$0xff] %v60_v16  ;;  %v108_v28 = vxor.u32 2147483648, %v152_v25  ;;  %v116_v29 = vxor.u32 2147483648, %v154_v26  ;;  %v156_v30 = vld [vmem:[%s264_s0 + $0x78] sm:$0xff] }
   0x8   :  { %143 = vst [vmem:[%s265_s1 + $0x8] sm:$0xff] %v68_v17  ;;  %145 = vst [vmem:[%s265_s1 + $0x18] sm:$0xff] %v76_v21  ;;  %v124_v31 = vxor.u32 2147483648, %v156_v30 }
   0x9   :  { %147 = vst [vmem:[%s265_s1 + $0x28] sm:$0xff] %v84_v22  ;;  %149 = vst [vmem:[%s265_s1 + $0x38] sm:$0xff] %v92_v23 }
   0xa   :  { %151 = vst [vmem:[%s265_s1 + $0x48] sm:$0xff] %v100_v27  ;;  %153 = vst [vmem:[%s265_s1 + $0x58] sm:$0xff] %v108_v28 }
   0xb   :  { %155 = vst [vmem:[%s265_s1 + $0x68] sm:$0xff] %v116_v29  ;;  %157 = vst [vmem:[%s265_s1 + $0x78] sm:$0xff] %v124_v31 }

// kernel: fourier_prob_attention_forward.2
= control target key start
LH: loop header
LB: loop body
LE: loop exit
PB: predicated region body
PF: predicated region fallthrough
CT: control target
= control target key end

     0   :  { %9 = vsyncpa [#allocation3], 0  ;;  %s1639_s15 = smov 0   ;;  %s1641_s16 = smov 0   ;;  %s1883_s0 = inlined_call_operand.vmem [shape: f32[8,16,18], index: 0, kind: input, shape index: {}]   ;;  %s1884_s1 = inlined_call_operand.vmem [shape: f32[8,16,18], index: 1, kind: input, shape index: {}]   ;;  %s1885_s2 = inlined_call_operand.vmem [shape: f32[8,16,18], index: 2, kind: input, shape index: {}]   ;;  %s1886_s3 = inlined_call_operand.hbm [shape: f32[16,16], index: 3, kind: input, shape index: {}]   ;;  %s1887_s4 = inlined_call_operand.vmem [shape: f32[8,1,16], index: 4, kind: output, shape index: {}]  }
   0x1   :  { %s1643_s17 = smov 0  }
   0x2 LB: > { %s1376_s18 = sadd.s32 4294967295, %s1608_s17   ;;  %s27_s19 = sadd.s32 1, %s1604_s16  ;;  %s1608_s17 = sphi %s1643_s17, %s15_s17   ;;  %s1604_s16 = sphi %s1641_s16, %s1891_s16   ;;  %s1600_s15 = sphi %s1639_s15, %s1890_s15  }
   0x3   : > { %p29_p0 = scmp.ge.s32.totalorder %s27_s19, 2  ;;  %p1378_p1 = scmp.ge.s32.totalorder %s1608_s17, 1 }
   0x4   : > { %p168_p2 = scmp.lt.s32.totalorder %s1608_s17, 3  ;;  %p1664_p4 = scmp.eq.s32.totalorder %s1376_s18, 0 }
   0x5   : > { %s1893_s19 = smov (%p29_p0, %s27_s19), 0  ;;  %s1610_s22 = smov [#allocation2]  }
   0x6   : > { %p1660_p3 = pnand %p1378_p1, %p168_p2  ;;  %s183_s23 = sshll.u32 %s1610_s22, 4  ;;  %s184_s23 = int_to_ptr.vmem [resolvable:$true] %s183_s23 }
   0x7   : > { %s1567_s24 = scalar_lea.vmem %s184_s23, 256  ;;  %p1575_p11 = scmp.lt.s32.totalorder %s184_s23, %s184_s23 }
   0x8   : > { %p1522_p5 = pneg %p1660_p3  ;;  %p1568_p8 = scmp.ne.s32.totalorder %s184_s23, %s1567_s24 }
   0x9   : > { %p1576_p12 = scmp.lt.s32.totalorder %s1567_s24, %s1567_s24 }
   0xa   : > { %p1523_p6 = pnand %p1664_p4, %p1522_p5 }
   0xb   : > { %p1577_p13 = por %p1576_p12, %p1575_p11 }
   0xc   : > { %p1558_p7 = pneg %p1523_p6 }
   0xe   : > { %p1570_p9 = pnand %p1568_p8, %p1558_p7 }
  0x10   : > { %p1571_p10 = pneg %p1570_p9 }
  0x12   : > { %p1578_p0 = pnand %p1577_p13, %p1571_p10 }
  0x14   : > { %1581 = shalt.err (!%p1578_p0)
}
  0x15   : > { %s1611_s25 = smov 128   ;;  %s1612_s26 = smov 8  }
  0x16   : > { %1525 = dma.hbm_to_vmem [thread:$0]  (!%p1523_p6), %s1886_s3, 256, %s184_s23, [#allocation3], %s1611_s25, %s1611_s25, %s1612_s26  }
  0x17   : > { %239 = sbr.rel (%p1660_p3) target bundleno = 446 (0x1be), region = 36 }
  0x1c   : > { %1595 = dma.done.wait (%p1664_p4), [#allocation3], 256  }
  0x1d   : > { %1597 = vsyncadd (%p1664_p4), [#allocation3], 4294967040  ;;  %s1383_s29 = sshll.u32 %s1600_s15, 2  ;;  %vm354_vm0 = vcmask 146432   ;;  %v1767_v24 = vld [vmem:[#allocation2 + $0x8] sm:$0xff]  ;;  %vm1039_vm2 = vcmask 130048  }
  0x1e   : > { %p290_p1 = scmp.lt.s32.totalorder %s1383_s29, 7  ;;  %vm1028_vm1 = vcmp.gt.f32.partialorder %v1767_v24, 0.0  ;;  %v1613_v27 = vmov -1e+30   ;;  %v1774_v32 = vld [vmem:[#allocation2] sm:$0xff]  ;;  %vm1219_vm4 = vcmask 130112  }
  0x1f   : > { %v1770_v28 = vsel %vm1028_vm1, 0.0, %v1613_v27  ;;  %vm1027_vm3 = vcmp.gt.f32.partialorder %v1774_v32, 0.0  ;;  %vm1252_vm5 = vcmask 122880  }
  0x20   : > { %s1895_s29 = smov (!%p290_p1, %s1383_s29), 7  ;;  %v1785_v42 = vsel %vm1027_vm3, 0.0, %v1613_v27 }
  0x21   : > { %s1685_s30 = sshll.u32 %s1895_s29, 4  ;;  %s1855_s18 = scalar_lea.vmem %s1887_s4, %s1895_s29 }
  0x22   : > { %s317_s7 = scalar_lea.vmem %s1885_s2, %s1685_s30  ;;  %s1695_s10 = scalar_lea.vmem %s1883_s0, %s1685_s30 }
  0x23   : > { %v345_v0 = vld [vmem:[%s317_s7 + $0x8] sm:$0xff]  ;;  %v347_v1 = vld [vmem:[%s317_s7 + $0x18] sm:$0xff]  ;;  %v344_v2 = vld [vmem:[%s317_s7] sm:$0xff]  ;;  %s1727_s13 = scalar_lea.vmem %s1884_s1, %s1685_s30 }
  0x24   : > { %1462 = vmatprep.subr.msk.mxu0 %vm354_vm0, %v345_v0  ;;  %1469 = vmatprep.subr.msk.mxu1 %vm354_vm0, %v347_v1  ;;  %v346_v3 = vld [vmem:[%s317_s7 + $0x10] sm:$0xff]  ;;  %v328_v4 = vld [vmem:[%s1695_s10] sm:$0xff]  ;;  %v349_v6 = vld [vmem:[%s317_s7 + $0x28] sm:$0xff] }
  0x25   : > { %v330_v5 = vld [vmem:[%s1695_s10 + $0x10] sm:$0xff]  ;;  %1463 = vmatpush3.xpose.msk.msra.mxu0 %vm354_vm0, %v345_v0  ;;  %1470 = vmatpush3.xpose.msk.msra.mxu1 %vm354_vm0, %v347_v1  ;;  %v351_v7 = vld [vmem:[%s317_s7 + $0x38] sm:$0xff]  ;;  %v329_v8 = vld [vmem:[%s1695_s10 + $0x8] sm:$0xff] }
  0x26   : > { %1464 = vmatprep.subr.msk.mxu0 %vm354_vm0, %v344_v2  ;;  %1471 = vmatprep.subr.msk.mxu1 %vm354_vm0, %v346_v3  ;;  %v331_v9 = vld [vmem:[%s1695_s10 + $0x18] sm:$0xff]  ;;  %v348_v10 = vld [vmem:[%s317_s7 + $0x20] sm:$0xff]  ;;  %v350_v12 = vld [vmem:[%s317_s7 + $0x30] sm:$0xff] }
  0x27   : > { %1466 = vmatprep.mubr.msk.f32.mxu0 %vm354_vm0, %v328_v4  ;;  %1473 = vmatprep.mubr.msk.f32.mxu1 %vm354_vm0, %v330_v5  ;;  %v332_v11 = vld [vmem:[%s1695_s10 + $0x20] sm:$0xff]  ;;  %v334_v13 = vld [vmem:[%s1695_s10 + $0x30] sm:$0xff]  ;;  %v333_v14 = vld [vmem:[%s1695_s10 + $0x28] sm:$0xff] }
  0x28   : > { %v335_v15 = vld [vmem:[%s1695_s10 + $0x38] sm:$0xff]  ;;  %v336_v16 = vld [vmem:[%s1727_s13] sm:$0xff]  ;;  %v338_v17 = vld [vmem:[%s1727_s13 + $0x10] sm:$0xff] }
  0x29   : > { %1465 = vmatpush3.xpose.msk.msra.mxu0 %vm354_vm0, %v344_v2  ;;  %1472 = vmatpush3.xpose.msk.msra.mxu1 %vm354_vm0, %v346_v3  ;;  %v337_v18 = vld [vmem:[%s1727_s13 + $0x8] sm:$0xff]  ;;  %v339_v19 = vld [vmem:[%s1727_s13 + $0x18] sm:$0xff]  ;;  %v340_v20 = vld [vmem:[%s1727_s13 + $0x20] sm:$0xff] }
  0x2a   : > { %1476 = vmatprep.subr.msk.mxu0 %vm354_vm0, %v349_v6  ;;  %1483 = vmatprep.subr.msk.mxu1 %vm354_vm0, %v351_v7  ;;  %v342_v21 = vld [vmem:[%s1727_s13 + $0x30] sm:$0xff]  ;;  %v341_v22 = vld [vmem:[%s1727_s13 + $0x28] sm:$0xff]  ;;  %v343_v23 = vld [vmem:[%s1727_s13 + $0x38] sm:$0xff] }
  0x2c   : > { %1467 = vmatmul.mubr.msk.f32.vlgmr.msra.gmra.mxu0 %vm354_vm0, %v329_v8  ;;  %1474 = vmatmul.mubr.msk.f32.vlgmr.msra.gmra.mxu1 %vm354_vm0, %v331_v9 }
  0x2d   : > { %1477 = vmatpush3.xpose.msk.msra.mxu0 %vm354_vm0, %v349_v6  ;;  %1484 = vmatpush3.xpose.msk.msra.mxu1 %vm354_vm0, %v351_v7 }
  0x2e   : > { %1478 = vmatprep.subr.msk.mxu0 %vm354_vm0, %v348_v10  ;;  %1480 = vmatprep.mubr.msk.f32.mxu0 %vm354_vm0, %v332_v11 }
  0x2f   : > { %1485 = vmatprep.subr.msk.mxu1 %vm354_vm0, %v350_v12  ;;  %1487 = vmatprep.mubr.msk.f32.mxu1 %vm354_vm0, %v334_v13 }
  0x31   : > { %1479 = vmatpush3.xpose.msk.msra.mxu0 %vm354_vm0, %v348_v10  ;;  %1486 = vmatpush3.xpose.msk.msra.mxu1 %vm354_vm0, %v350_v12 }
  0x32   : > { %1490 = vmatprep.subr.msk.mxu0 %vm354_vm0, %v345_v0  ;;  %1497 = vmatprep.subr.msk.mxu1 %vm354_vm0, %v347_v1 }
  0x34   : > { %1481 = vmatmul.mubr.msk.f32.vlgmr.msra.gmra.mxu0 %vm354_vm0, %v333_v14  ;;  %1488 = vmatmul.mubr.msk.f32.vlgmr.msra.gmra.mxu1 %vm354_vm0, %v335_v15 }
  0x35   : > { %1491 = vmatpush3.xpose.msk.msra.mxu0 %vm354_vm0, %v345_v0  ;;  %1498 = vmatpush3.xpose.msk.msra.mxu1 %vm354_vm0, %v347_v1 }
  0x36   : > { %1492 = vmatprep.subr.msk.mxu0 %vm354_vm0, %v344_v2  ;;  %1494 = vmatprep.mubr.msk.f32.mxu0 %vm354_vm0, %v336_v16 }
  0x37   : > { %1499 = vmatprep.subr.msk.mxu1 %vm354_vm0, %v346_v3  ;;  %1501 = vmatprep.mubr.msk.f32.mxu1 %vm354_vm0, %v338_v17 }
  0x39   : > { %1493 = vmatpush3.xpose.msk.msra.mxu0 %vm354_vm0, %v344_v2  ;;  %1500 = vmatpush3.xpose.msk.msra.mxu1 %vm354_vm0, %v346_v3 }
  0x3a   : > { %1504 = vmatprep.subr.msk.mxu0 %vm354_vm0, %v349_v6  ;;  %1511 = vmatprep.subr.msk.mxu1 %vm354_vm0, %v351_v7 }
  0x3c   : > { %1495 = vmatmul.mubr.msk.f32.vlgmr.msra.gmra.mxu0 %vm354_vm0, %v337_v18  ;;  %1502 = vmatmul.mubr.msk.f32.vlgmr.msra.gmra.mxu1 %vm354_vm0, %v339_v19 }
  0x3d   : > { %1505 = vmatpush3.xpose.msk.msra.mxu0 %vm354_vm0, %v349_v6  ;;  %1512 = vmatpush3.xpose.msk.msra.mxu1 %vm354_vm0, %v351_v7 }
  0x3e   : > { %1506 = vmatprep.subr.msk.mxu0 %vm354_vm0, %v348_v10  ;;  %1508 = vmatprep.mubr.msk.f32.mxu0 %vm354_vm0, %v340_v20 }
  0x3f   : > { %1513 = vmatprep.subr.msk.mxu1 %vm354_vm0, %v350_v12  ;;  %1515 = vmatprep.mubr.msk.f32.mxu1 %vm354_vm0, %v342_v21 }
  0x41   : > { %1507 = vmatpush3.xpose.msk.msra.mxu0 %vm354_vm0, %v348_v10  ;;  %1514 = vmatpush3.xpose.msk.msra.mxu1 %vm354_vm0, %v350_v12 }
  0x44   : > { %1509 = vmatmul.mubr.msk.f32.vlgmr.msra.gmra.mxu0 %vm354_vm0, %v341_v22  ;;  %1516 = vmatmul.mubr.msk.f32.vlgmr.msra.gmra.mxu1 %vm354_vm0, %v343_v23 }
  0xec   : > { %v1468_v25 = vpop.f32.mrf.mxu0  ;;  %v1475_v26 = vpop.f32.mrf.mxu1 }
  0xed   : > { %v1067_v29 = vmul.f32 %v1475_v26, %v1767_v24  ;;  %v1065_v30 = vmul.f32 %v1468_v25, %v1767_v24  ;;  %v1032_v33 = vadd.f32 %v1468_v25, %v1770_v28  ;;  %v1034_v38 = vadd.f32 %v1475_v26, %v1770_v28 }
  0xee   : > { %v433_v31 = vpop.f32.mrf.mxu0  ;;  %v520_v37 = vpop.f32.mrf.mxu1 }
  0xef   : > { %v1064_v34 = vmul.f32 %v433_v31, %v1774_v32  ;;  %v1081_v35 = vsel %vm1039_vm2, %v1067_v29, 0.0  ;;  %v1075_v36 = vsel %vm1039_vm2, %v1065_v30, 0.0  ;;  %v1066_v39 = vmul.f32 %v520_v37, %v1774_v32 }
  0xf0   : > { %1082 = vadd.xlane.f32.xlu1 %v1081_v35  ;;  %1076 = vadd.xlane.f32.xlu0 %v1075_v36  ;;  %v1043_v40 = vsel %vm1039_vm2, %v1032_v33, -inf  ;;  %v1031_v45 = vadd.f32 %v1785_v42, %v433_v31  ;;  %v1049_v46 = vsel %vm1039_vm2, %v1034_v38, -inf  ;;  %v1033_v51 = vadd.f32 %v1785_v42, %v520_v37 }
  0xf1   : > { %v1072_v41 = vsel %vm1039_vm2, %v1064_v34, 0.0  ;;  %v1078_v47 = vsel %vm1039_vm2, %v1066_v39, 0.0 }
  0xf2   : > { %v1040_v52 = vsel %vm1039_vm2, %v1031_v45, -inf  ;;  %v1046_v57 = vsel %vm1039_vm2, %v1033_v51, -inf }
  0xf4   : > { %1044 = vmax.xlane.f32.xlu1 %v1043_v40  ;;  %1073 = vadd.xlane.f32.xlu0 %v1072_v41  ;;  %v1482_v43 = vpop.f32.mrf.mxu0  ;;  %v1489_v48 = vpop.f32.mrf.mxu1 }
  0xf5   : > { %v1069_v44 = vmul.f32 %v1482_v43, %v1767_v24  ;;  %v1071_v49 = vmul.f32 %v1489_v48, %v1767_v24  ;;  %v1036_v55 = vadd.f32 %v1482_v43, %v1770_v28  ;;  %v1038_v59 = vadd.f32 %v1489_v48, %v1770_v28 }
  0xf6   : > { %v607_v53 = vpop.f32.mrf.mxu0  ;;  %v694_v58 = vpop.f32.mrf.mxu1 }
  0xf7   : > { %v1087_v50 = vsel %vm1039_vm2, %v1069_v44, 0.0  ;;  %v1093_v54 = vsel %vm1039_vm2, %v1071_v49, 0.0  ;;  %v1068_v56 = vmul.f32 %v607_v53, %v1774_v32  ;;  %v1070_v60 = vmul.f32 %v694_v58, %v1774_v32 }
  0xf8   : > { %1050 = vmax.xlane.f32.xlu1 %v1049_v46  ;;  %1079 = vadd.xlane.f32.xlu0 %v1078_v47  ;;  %v1055_v61 = vsel %vm1039_vm2, %v1036_v55, -inf  ;;  %v1035_v1 = vadd.f32 %v1785_v42, %v607_v53  ;;  %v1061_v2 = vsel %vm1039_vm2, %v1038_v59, -inf  ;;  %v1037_v7 = vadd.f32 %v1785_v42, %v694_v58 }
  0xf9   : > { %v1084_v62 = vsel %vm1039_vm2, %v1068_v56, 0.0  ;;  %v1090_v3 = vsel %vm1039_vm2, %v1070_v60, 0.0 }
  0xfa   : > { %v1052_v8 = vsel %vm1039_vm2, %v1035_v1, -inf  ;;  %v1058_v13 = vsel %vm1039_vm2, %v1037_v7, -inf }
  0xfc   : > { %1041 = vmax.xlane.f32.xlu0 %v1040_v52  ;;  %1088 = vadd.xlane.f32.xlu1 %v1087_v50  ;;  %v1496_v63 = vpop.f32.mrf.mxu0  ;;  %v1503_v4 = vpop.f32.mrf.mxu1 }
  0xfd   : > { %v1145_v0 = vmul.f32 %v1496_v63, %v1767_v24  ;;  %v1147_v5 = vmul.f32 %v1503_v4, %v1767_v24  ;;  %v1113_v11 = vadd.f32 %v1496_v63, %v1770_v28  ;;  %v1115_v16 = vadd.f32 %v1503_v4, %v1770_v28 }
  0xfe   : > { %v856_v9 = vpop.f32.mrf.mxu1  ;;  %v775_v14 = vpop.f32.mrf.mxu0  ;;  %v1208_v63 = vlaneseq }
  0xff   : > { %v1155_v6 = vsel %vm1039_vm2, %v1145_v0, 0.0  ;;  %v1161_v10 = vsel %vm1039_vm2, %v1147_v5, 0.0  ;;  %v1146_v12 = vmul.f32 %v856_v9, %v1774_v32  ;;  %v1112_v15 = vadd.f32 %v1785_v42, %v775_v14 }
 0x100   : > { %1047 = vmax.xlane.f32.xlu0 %v1046_v57  ;;  %1094 = vadd.xlane.f32.xlu1 %v1093_v54  ;;  %v1123_v18 = vsel %vm1039_vm2, %v1113_v11, -inf  ;;  %v1144_v20 = vmul.f32 %v775_v14, %v1774_v32  ;;  %v1114_v21 = vadd.f32 %v1785_v42, %v856_v9  ;;  %v1129_v22 = vsel %vm1039_vm2, %v1115_v16, -inf }
 0x101   : > { %v1158_v17 = vsel %vm1039_vm2, %v1146_v12, 0.0  ;;  %v1120_v23 = vsel %vm1039_vm2, %v1112_v15, -inf }
 0x102   : > { %v1152_v30 = vsel %vm1039_vm2, %v1144_v20, 0.0  ;;  %v1126_v31 = vsel %vm1039_vm2, %v1114_v21, -inf }
 0x104   : > { %1056 = vmax.xlane.f32.xlu1 %v1055_v61  ;;  %1085 = vadd.xlane.f32.xlu0 %v1084_v62  ;;  %v1510_v19 = vpop.f32.mrf.mxu0  ;;  %v1517_v26 = vpop.f32.mrf.mxu1 }
 0x105   : > { %v1149_v27 = vmul.f32 %v1510_v19, %v1767_v24  ;;  %v1151_v34 = vmul.f32 %v1517_v26, %v1767_v24  ;;  %v1117_v38 = vadd.f32 %v1510_v19, %v1770_v28  ;;  %v1119_v24 = vadd.f32 %v1517_v26, %v1770_v28 }
 0x106   : > { %v937_v25 = vpop.f32.mrf.mxu0  ;;  %v1018_v33 = vpop.f32.mrf.mxu1 }
 0x107   : > { %v1148_v29 = vmul.f32 %v937_v25, %v1774_v32  ;;  %v1150_v35 = vmul.f32 %v1018_v33, %v1774_v32  ;;  %v1167_v36 = vsel %vm1039_vm2, %v1149_v27, 0.0  ;;  %v1116_v39 = vadd.f32 %v1785_v42, %v937_v25 }
 0x108   : > { %1062 = vmax.xlane.f32.xlu1 %v1061_v2  ;;  %1091 = vadd.xlane.f32.xlu0 %v1090_v3  ;;  %v1173_v40 = vsel %vm1039_vm2, %v1151_v34, 0.0  ;;  %v1118_v32 = vadd.f32 %v1785_v42, %v1018_v33  ;;  %v1135_v43 = vsel %vm1039_vm2, %v1117_v38, -inf  ;;  %v1141_v45 = vsel %vm1039_vm2, %v1119_v24, -inf }
 0x109   : > { %v1164_v37 = vsel %vm1039_vm2, %v1148_v29, 0.0  ;;  %v1170_v41 = vsel %vm1039_vm2, %v1150_v35, 0.0  ;;  %v1132_v44 = vsel %vm1039_vm2, %v1116_v39, -inf  ;;  %v1209_v2 = vand.u32 127, %v1208_v63 }
 0x10a   : > { %v1138_v46 = vsel %vm1039_vm2, %v1118_v32, -inf }
 0x10b   : > { %v1214_v9 = vadd.s32 4294967288, %v1209_v2 }
 0x10c   : > { %1053 = vmax.xlane.f32.xlu0 %v1052_v8  ;;  %1156 = vadd.xlane.f32.xlu1 %v1155_v6  ;;  %v1211_v8 = vshrl.u32 %v1208_v63, 7 }
 0x10e   : > { %v1212_v25 = vsub.s32 %v1209_v2, %v1211_v8 }
 0x110   : > { %1059 = vmax.xlane.f32.xlu0 %v1058_v13  ;;  %1162 = vadd.xlane.f32.xlu1 %v1161_v10 }
 0x114   : > { %1159 = vadd.xlane.f32.xlu0 %v1158_v17  ;;  %1124 = vmax.xlane.f32.xlu1 %v1123_v18 }
 0x118   : > { %1130 = vmax.xlane.f32.xlu1 %v1129_v22  ;;  %1121 = vmax.xlane.f32.xlu0 %v1120_v23  ;;  %v1217_v23 = vsub.s32 %v1214_v9, %v1211_v8 }
 0x11c   : > { %1153 = vadd.xlane.f32.xlu1 %v1152_v30  ;;  %1127 = vmax.xlane.f32.xlu0 %v1126_v31 }
 0x120   : > { %1168 = vadd.xlane.f32.xlu1 %v1167_v36  ;;  %1165 = vadd.xlane.f32.xlu0 %v1164_v37 }
 0x124   : > { %1174 = vadd.xlane.f32.xlu1 %v1173_v40  ;;  %1171 = vadd.xlane.f32.xlu0 %v1170_v41 }
 0x128   : > { %1136 = vmax.xlane.f32.xlu1 %v1135_v43  ;;  %1133 = vmax.xlane.f32.xlu0 %v1132_v44 }
 0x12c   : > { %1142 = vmax.xlane.f32.xlu1 %v1141_v45  ;;  %1139 = vmax.xlane.f32.xlu0 %v1138_v46 }
 0x179   : > { %v1083_v47 = vpop.xlane.xlu1 %1082  ;;  %v1077_v48 = vpop.xlane.xlu0 %1076 }
 0x17a   : > { %v1097_v6 = vmul.f32 0.0625, %v1077_v48  ;;  %v1099_v13 = vmul.f32 0.0625, %v1083_v47 }
 0x17d   : > { %v1045_v49 = vpop.xlane.xlu1 %1044  ;;  %v1074_v50 = vpop.xlane.xlu0 %1073 }
 0x17e   : > { %v1105_v14 = vsub.f32 %v1045_v49, %v1097_v6  ;;  %v1096_v18 = vmul.f32 0.0625, %v1074_v50 }
 0x181   : > { %v1051_v51 = vpop.xlane.xlu1 %1050  ;;  %v1080_v28 = vpop.xlane.xlu0 %1079 }
 0x182   : > { %v1098_v10 = vmul.f32 0.0625, %v1080_v28  ;;  %v1107_v22 = vsub.f32 %v1051_v51, %v1099_v13 }
 0x185   : > { %v1042_v52 = vpop.xlane.xlu0 %1041  ;;  %v1089_v42 = vpop.xlane.xlu1 %1088 }
 0x186   : > { %v1104_v26 = vsub.f32 %v1042_v52, %v1096_v18  ;;  %v1101_v43 = vmul.f32 0.0625, %v1089_v42 }
 0x189   : > { %v1048_v53 = vpop.xlane.xlu0 %1047  ;;  %v1841_v54 = vpop.xlane.xlu1 %1094 }
 0x18a   : > { %v1106_v19 = vsub.f32 %v1048_v53, %v1098_v10  ;;  %v1103_v52 = vmul.f32 0.0625, %v1841_v54 }
 0x18d   : > { %v1843_v55 = vpop.xlane.xlu1 %1056  ;;  %v1086_v56 = vpop.xlane.xlu0 %1085 }
 0x18e   : > { %v1100_v44 = vmul.f32 0.0625, %v1086_v56  ;;  %v1109_v49 = vsub.f32 %v1843_v55, %v1101_v43 }
 0x191   : > { %v1845_v57 = vpop.xlane.xlu1 %1062  ;;  %v1092_v58 = vpop.xlane.xlu0 %1091 }
 0x192   : > { %v1102_v53 = vmul.f32 0.0625, %v1092_v58  ;;  %v1111_v63 = vsub.f32 %v1845_v57, %v1103_v52 }
 0x195   : > { %v1847_v59 = vpop.xlane.xlu0 %1053  ;;  %v1157_v60 = vpop.xlane.xlu1 %1156 }
 0x196   : > { %v1177_v5 = vmul.f32 0.0625, %v1157_v60  ;;  %v1108_v50 = vsub.f32 %v1847_v59, %v1100_v44 }
 0x199   : > { %v1849_v61 = vpop.xlane.xlu0 %1059  ;;  %v1163_v62 = vpop.xlane.xlu1 %1162 }
 0x19a   : > { %v1179_v7 = vmul.f32 0.0625, %v1163_v62 }
 0x19d   : > { %v1160_v0 = vpop.xlane.xlu0 %1159  ;;  %v1125_v1 = vpop.xlane.xlu1 %1124 }
 0x19e   : > { %v1178_v11 = vmul.f32 0.0625, %v1160_v0  ;;  %v1185_v12 = vsub.f32 %v1125_v1, %v1177_v5  ;;  %v1110_v0 = vsub.f32 %v1849_v61, %v1102_v53 }
 0x1a0   : > { %v1193_v27 = vadd.f32 %v1185_v12, %v1105_v14 }
 0x1a1   : > { %v1131_v3 = vpop.xlane.xlu1 %1130  ;;  %v1122_v4 = vpop.xlane.xlu0 %1121 }
 0x1a2   : > { %v1187_v15 = vsub.f32 %v1131_v3, %v1179_v7  ;;  %v1218_v37 = vrot.slane %v1193_v27, %v1217_v23 }
 0x1a4   : > { %v1195_v31 = vadd.f32 %v1187_v15, %v1107_v22 }
 0x1a5   : > { %v1154_v16 = vpop.xlane.xlu1 %1153  ;;  %v1128_v17 = vpop.xlane.xlu0 %1127 }
 0x1a6   : > { %v1176_v20 = vmul.f32 0.0625, %v1154_v16  ;;  %v1186_v21 = vsub.f32 %v1128_v17, %v1178_v11  ;;  %v1228_v39 = vrot.slane %v1195_v31, %v1217_v23 }
 0x1a8   : > { %v1184_v29 = vsub.f32 %v1122_v4, %v1176_v20  ;;  %v1194_v30 = vadd.f32 %v1186_v21, %v1106_v19 }
 0x1a9   : > { %v1169_v33 = vpop.xlane.xlu1 %1168  ;;  %v1166_v34 = vpop.xlane.xlu0 %1165 }
 0x1aa   : > { %v1192_v35 = vadd.f32 %v1184_v29, %v1104_v26  ;;  %v1224_v36 = vrot.slane %v1194_v30, %v1212_v25  ;;  %v1181_v45 = vmul.f32 0.0625, %v1169_v33  ;;  %v1180_v46 = vmul.f32 0.0625, %v1166_v34 }
 0x1ac   : > { %v1213_v38 = vrot.slane %v1192_v35, %v1212_v25  ;;  %v1229_v32 = vsel %vm1219_vm4, %v1228_v39, %v1224_v36 }
 0x1ad   : > { %v1175_v40 = vpop.xlane.xlu1 %1174  ;;  %v1172_v41 = vpop.xlane.xlu0 %1171  ;;  %1254 = vst.msk [vmem:[%s1855_s18 + $0x1] sm:$0x1] %vm1252_vm5, %v1229_v32 }
 0x1ae   : > { %v1220_v24 = vsel %vm1219_vm4, %v1218_v37, %v1213_v38  ;;  %v1183_v60 = vmul.f32 0.0625, %v1175_v40  ;;  %v1182_v62 = vmul.f32 0.0625, %v1172_v41 }
 0x1af   : > { %1253 = vst.msk [vmem:[%s1855_s18] sm:$0x1] %vm1252_vm5, %v1220_v24 }
 0x1b1   : > { %v1137_v47 = vpop.xlane.xlu1 %1136  ;;  %v1134_v48 = vpop.xlane.xlu0 %1133 }
 0x1b2   : > { %v1189_v51 = vsub.f32 %v1137_v47, %v1181_v45  ;;  %v1188_v28 = vsub.f32 %v1134_v48, %v1180_v46 }
 0x1b4   : > { %v1197_v42 = vadd.f32 %v1189_v51, %v1109_v49  ;;  %v1196_v56 = vadd.f32 %v1188_v28, %v1108_v50 }
 0x1b5   : > { %v1143_v1 = vpop.xlane.xlu1 %1142  ;;  %v1140_v2 = vpop.xlane.xlu0 %1139 }
 0x1b6   : > { %v1237_v55 = vrot.slane %v1197_v42, %v1217_v23  ;;  %v1233_v3 = vrot.slane %v1196_v56, %v1212_v25  ;;  %v1191_v59 = vsub.f32 %v1143_v1, %v1183_v60  ;;  %v1190_v4 = vsub.f32 %v1140_v2, %v1182_v62 }
 0x1b8   : > { %v1238_v5 = vsel %vm1219_vm4, %v1237_v55, %v1233_v3  ;;  %v1199_v54 = vadd.f32 %v1191_v59, %v1111_v63  ;;  %v1198_v58 = vadd.f32 %v1190_v4, %v1110_v0 }
 0x1b9   : > { %1255 = vst.msk [vmem:[%s1855_s18 + $0x2] sm:$0x1] %vm1252_vm5, %v1238_v5 }
 0x1ba   : > { %v1246_v6 = vrot.slane %v1199_v54, %v1217_v23  ;;  %v1242_v7 = vrot.slane %v1198_v58, %v1212_v25 }
 0x1bc   : > { %v1247_v8 = vsel %vm1219_vm4, %v1246_v6, %v1242_v7 }
 0x1bd   : > { %1256 = vst.msk [vmem:[%s1855_s18 + $0x3] sm:$0x1] %vm1252_vm5, %v1247_v8 }
 0x1be PF: > { %s15_s17 = sadd.s32 1, %s1608_s17   ;;  %s1890_s15 = smov %s1604_s16 }
 0x1bf   : > { %p12_p2 = scmp.ge.s32.totalorder %s15_s17, 4   ;;  %s1891_s16 = smov %s1893_s19 }
 0x1c1   :  { %14 = sbr.rel (!%p12_p2) target bundleno = 2 (0x2), region = 78 }
 0x1c6   :  { %1283 = vsyncpa [#allocation3], 1 }
 0x1c7   :  { %1285 = vsyncpa [#allocation3 + $0x1], 1 }

// kernel: reverse.0
= control target key start
LH: loop header
LB: loop body
LE: loop exit
PB: predicated region body
PF: predicated region fallthrough
CT: control target
= control target key end

     0   :  { %v2_v0 = vlaneseq  ;;  %s414_s0 = inlined_call_operand.vmem [shape: f32[2,4,16,7], index: 0, kind: input, shape index: {}]   ;;  %s415_s1 = inlined_call_operand.vmem [shape: f32[2,4,16,7], index: 1, kind: output, shape index: {}]  }
   0x1   :  { %v67_v2 = vld [vmem:[%s414_s0 + $0x10] sm:$0xff]  ;;  %v63_v3 = vld [vmem:[%s414_s0] sm:$0xff]  ;;  %v69_v4 = vld [vmem:[%s414_s0 + $0x18] sm:$0xff] }
   0x2   :  { %v3_v1 = vsub.s32 6, %v2_v0  ;;  %v65_v5 = vld [vmem:[%s414_s0 + $0x8] sm:$0xff]  ;;  %v71_v7 = vld [vmem:[%s414_s0 + $0x20] sm:$0xff]  ;;  %v77_v8 = vld [vmem:[%s414_s0 + $0x38] sm:$0xff] }
   0x3   :  { %v73_v6 = vld [vmem:[%s414_s0 + $0x28] sm:$0xff]  ;;  %v75_v9 = vld [vmem:[%s414_s0 + $0x30] sm:$0xff]  ;;  %v79_v11 = vld [vmem:[%s414_s0 + $0x40] sm:$0xff] }
   0x4   :  { %4 = vset.pattern.permute.xlu0 %v3_v1  ;;  %307 = vset.pattern.permute.xlu1 %v3_v1  ;;  %v81_v10 = vld [vmem:[%s414_s0 + $0x48] sm:$0xff]  ;;  %v85_v12 = vld [vmem:[%s414_s0 + $0x58] sm:$0xff]  ;;  %v83_v13 = vld [vmem:[%s414_s0 + $0x50] sm:$0xff] }
   0x5   :  { %111 = vperm.xlu1 %307, %v67_v2   ;;  %99 = vperm.xlu0 %4, %v63_v3   ;;  %v89_v14 = vld [vmem:[%s414_s0 + $0x68] sm:$0xff]  ;;  %v87_v15 = vld [vmem:[%s414_s0 + $0x60] sm:$0xff]  ;;  %v93_v16 = vld [vmem:[%s414_s0 + $0x78] sm:$0xff] }
   0x6   :  { %v91_v17 = vld [vmem:[%s414_s0 + $0x70] sm:$0xff] }
   0x9   :  { %117 = vperm.xlu1 %307, %v69_v4   ;;  %105 = vperm.xlu0 %4, %v65_v5  }
   0xd   :  { %129 = vperm.xlu1 %307, %v73_v6   ;;  %123 = vperm.xlu0 %4, %v71_v7  }
  0x11   :  { %141 = vperm.xlu1 %307, %v77_v8   ;;  %135 = vperm.xlu0 %4, %v75_v9  }
  0x15   :  { %153 = vperm.xlu1 %307, %v81_v10   ;;  %147 = vperm.xlu0 %4, %v79_v11  }
  0x19   :  { %165 = vperm.xlu1 %307, %v85_v12   ;;  %159 = vperm.xlu0 %4, %v83_v13  }
  0x1d   :  { %177 = vperm.xlu1 %307, %v89_v14   ;;  %171 = vperm.xlu0 %4, %v87_v15  }
  0x21   :  { %189 = vperm.xlu1 %307, %v93_v16   ;;  %183 = vperm.xlu0 %4, %v91_v17  }
  0x80   :  { %v112_v18 = vpop.permute.xlu1 %111  ;;  %v100_v19 = vpop.permute.xlu0 %99 }
  0x81   :  { %255 = vst [vmem:[%s415_s1 + $0x10] sm:$0xff] %v112_v18  ;;  %251 = vst [vmem:[%s415_s1] sm:$0xff] %v100_v19 }
  0x84   :  { %v118_v20 = vpop.permute.xlu1 %117  ;;  %v106_v21 = vpop.permute.xlu0 %105 }
  0x85   :  { %257 = vst [vmem:[%s415_s1 + $0x18] sm:$0xff] %v118_v20  ;;  %253 = vst [vmem:[%s415_s1 + $0x8] sm:$0xff] %v106_v21 }
  0x88   :  { %v130_v22 = vpop.permute.xlu1 %129  ;;  %v124_v23 = vpop.permute.xlu0 %123 }
  0x89   :  { %261 = vst [vmem:[%s415_s1 + $0x28] sm:$0xff] %v130_v22  ;;  %259 = vst [vmem:[%s415_s1 + $0x20] sm:$0xff] %v124_v23 }
  0x8c   :  { %v142_v24 = vpop.permute.xlu1 %141  ;;  %v136_v25 = vpop.permute.xlu0 %135 }
  0x8d   :  { %265 = vst [vmem:[%s415_s1 + $0x38] sm:$0xff] %v142_v24  ;;  %263 = vst [vmem:[%s415_s1 + $0x30] sm:$0xff] %v136_v25 }
  0x90   :  { %v154_v26 = vpop.permute.xlu1 %153  ;;  %v148_v27 = vpop.permute.xlu0 %147 }
  0x91   :  { %269 = vst [vmem:[%s415_s1 + $0x48] sm:$0xff] %v154_v26  ;;  %267 = vst [vmem:[%s415_s1 + $0x40] sm:$0xff] %v148_v27 }
  0x94   :  { %v166_v28 = vpop.permute.xlu1 %165  ;;  %v160_v29 = vpop.permute.xlu0 %159 }
  0x95   :  { %273 = vst [vmem:[%s415_s1 + $0x58] sm:$0xff] %v166_v28  ;;  %271 = vst [vmem:[%s415_s1 + $0x50] sm:$0xff] %v160_v29 }
  0x98   :  { %v178_v30 = vpop.permute.xlu1 %177  ;;  %v172_v31 = vpop.permute.xlu0 %171 }
  0x99   :  { %277 = vst [vmem:[%s415_s1 + $0x68] sm:$0xff] %v178_v30  ;;  %275 = vst [vmem:[%s415_s1 + $0x60] sm:$0xff] %v172_v31 }
  0x9c   :  { %v190_v32 = vpop.permute.xlu1 %189  ;;  %v184_v33 = vpop.permute.xlu0 %183 }
  0x9d   :  { %281 = vst [vmem:[%s415_s1 + $0x78] sm:$0xff] %v190_v32  ;;  %279 = vst [vmem:[%s415_s1 + $0x70] sm:$0xff] %v184_v33 }

// kernel: fourier_prob_attention_forward.3
= control target key start
LH: loop header
LB: loop body
LE: loop exit
PB: predicated region body
PF: predicated region fallthrough
CT: control target
= control target key end

     0   :  { %s3083_s21 = smov 0   ;;  %s3617_s0 = inlined_call_operand.vmem [shape: f32[8,15,18], index: 0, kind: input, shape index: {}]   ;;  %s3618_s1 = inlined_call_operand.vmem [shape: f32[8,15,18], index: 1, kind: input, shape index: {}]   ;;  %s3619_s2 = inlined_call_operand.vmem [shape: f32[8,16,18], index: 2, kind: input, shape index: {}]   ;;  %s3620_s3 = inlined_call_operand.vmem [shape: f32[8,16,9], index: 3, kind: input, shape index: {}]   ;;  %s3621_s4 = inlined_call_operand.vmem [shape: f32[8,16,9], index: 4, kind: input, shape index: {}]   ;;  %s3622_s5 = inlined_call_operand.vmem [shape: s32[8,1,15], index: 5, kind: input, shape index: {}]   ;;  %s3623_s6 = inlined_call_operand.vmem [shape: f32[8,16,18], index: 6, kind: output, shape index: {}]  }
   0x1 LB: > { %s2640_s22 = sadd.s32 4294967295, %s3044_s21   ;;  %p2644_p0 = scmp.ge.s32.totalorder %s3044_s21, 1  ;;  %s3044_s21 = sphi %s3083_s21, %s16_s21  }
   0x2   : > { %p272_p1 = scmp.lt.s32.totalorder %s3044_s21, 3 }
   0x4   : > { %p273_p2 = pnand %p2644_p0, %p272_p1 }
   0x5   : > { %s2645_s23 = sshll.u32 (!%p273_p2), %s2640_s22, 2  ;;  %s3047_s19 = smov (!%p273_p2), 9  }
   0x6   : > { %276 = sbr.rel (%p273_p2) target bundleno = 1080 (0x438), region = 44  ;;  %p333_p3 = scmp.lt.s32.totalorder (!%p273_p2), %s2645_s23, 7 }
   0xb   : > { %s3625_s23 = smov (!%p333_p3, %s2645_s23), 7  ;;  %vm423_vm0 = vcmask 146432   ;;  %vm1116_vm1 = vcmask 129024   ;;  %vm1112_vm2 = vcmask 130048   ;;  %vm1970_vm3 = vcmask 72704  }
   0xc   : > { %s3094_s24 = sshll.u32 %s3625_s23, 4  ;;  %s3450_s18 = scalar_lea.vmem %s3622_s5, %s3625_s23  ;;  %vm2123_vm5 = vcmask 121856   ;;  %vm2186_vm13 = vcmask 1046528  }
   0xd   : > { %s351_s27 = scalar_lea.vmem %s3619_s2, %s3094_s24  ;;  %s3104_s30 = scalar_lea.vmem %s3617_s0, %s3094_s24 }
   0xe   : > { %v396_v0 = vld [vmem:[%s351_s27 + $0x8] sm:$0xff]  ;;  %v398_v1 = vld [vmem:[%s351_s27 + $0x18] sm:$0xff]  ;;  %v395_v2 = vld [vmem:[%s351_s27] sm:$0xff]  ;;  %s3136_s9 = scalar_lea.vmem %s3618_s1, %s3094_s24  ;;  %s3318_s12 = scalar_lea.vmem %s3620_s3, %s3094_s24 }
   0xf   : > { %2824 = vmatprep.subr.msk.mxu0 %vm423_vm0, %v396_v0  ;;  %2831 = vmatprep.subr.msk.mxu1 %vm423_vm0, %v398_v1  ;;  %v397_v3 = vld [vmem:[%s351_s27 + $0x10] sm:$0xff]  ;;  %v379_v4 = vld [vmem:[%s3104_s30] sm:$0xff]  ;;  %v400_v6 = vld [vmem:[%s351_s27 + $0x28] sm:$0xff]  ;;  %s3352_s15 = scalar_lea.vmem %s3621_s4, %s3094_s24  ;;  %s3594_s23 = scalar_lea.vmem %s3623_s6, %s3094_s24 }
  0x10   : > { %v381_v5 = vld [vmem:[%s3104_s30 + $0x10] sm:$0xff]  ;;  %2825 = vmatpush3.xpose.msk.msra.mxu0 %vm423_vm0, %v396_v0  ;;  %2832 = vmatpush3.xpose.msk.msra.mxu1 %vm423_vm0, %v398_v1  ;;  %v402_v7 = vld [vmem:[%s351_s27 + $0x38] sm:$0xff]  ;;  %v380_v8 = vld [vmem:[%s3104_s30 + $0x8] sm:$0x7f] }
  0x11   : > { %2826 = vmatprep.subr.msk.mxu0 %vm423_vm0, %v395_v2  ;;  %2833 = vmatprep.subr.msk.mxu1 %vm423_vm0, %v397_v3  ;;  %v382_v9 = vld [vmem:[%s3104_s30 + $0x18] sm:$0x7f]  ;;  %v399_v10 = vld [vmem:[%s351_s27 + $0x20] sm:$0xff]  ;;  %v401_v12 = vld [vmem:[%s351_s27 + $0x30] sm:$0xff] }
  0x12   : > { %2828 = vmatprep.mubr.msk.f32.mxu0 %vm423_vm0, %v379_v4  ;;  %2835 = vmatprep.mubr.msk.f32.mxu1 %vm423_vm0, %v381_v5  ;;  %v383_v11 = vld [vmem:[%s3104_s30 + $0x20] sm:$0xff]  ;;  %v385_v13 = vld [vmem:[%s3104_s30 + $0x30] sm:$0xff]  ;;  %v384_v14 = vld [vmem:[%s3104_s30 + $0x28] sm:$0x7f] }
  0x13   : > { %v386_v15 = vld [vmem:[%s3104_s30 + $0x38] sm:$0x7f]  ;;  %v387_v16 = vld [vmem:[%s3136_s9] sm:$0xff]  ;;  %v389_v17 = vld [vmem:[%s3136_s9 + $0x10] sm:$0xff] }
  0x14   : > { %2827 = vmatpush3.xpose.msk.msra.mxu0 %vm423_vm0, %v395_v2  ;;  %2834 = vmatpush3.xpose.msk.msra.mxu1 %vm423_vm0, %v397_v3  ;;  %v388_v18 = vld [vmem:[%s3136_s9 + $0x8] sm:$0x7f]  ;;  %v390_v19 = vld [vmem:[%s3136_s9 + $0x18] sm:$0x7f]  ;;  %v391_v20 = vld [vmem:[%s3136_s9 + $0x20] sm:$0xff] }
  0x15   : > { %2838 = vmatprep.subr.msk.mxu0 %vm423_vm0, %v400_v6  ;;  %2845 = vmatprep.subr.msk.mxu1 %vm423_vm0, %v402_v7  ;;  %v393_v21 = vld [vmem:[%s3136_s9 + $0x30] sm:$0xff]  ;;  %v392_v22 = vld [vmem:[%s3136_s9 + $0x28] sm:$0x7f]  ;;  %v394_v23 = vld [vmem:[%s3136_s9 + $0x38] sm:$0x7f] }
  0x17   : > { %2829 = vmatmul.mubr.msk.f32.vlgmr.msra.gmra.mxu0 %vm423_vm0, %v380_v8  ;;  %2836 = vmatmul.mubr.msk.f32.vlgmr.msra.gmra.mxu1 %vm423_vm0, %v382_v9 }
  0x18   : > { %2839 = vmatpush3.xpose.msk.msra.mxu0 %vm423_vm0, %v400_v6  ;;  %2846 = vmatpush3.xpose.msk.msra.mxu1 %vm423_vm0, %v402_v7 }
  0x19   : > { %2840 = vmatprep.subr.msk.mxu0 %vm423_vm0, %v399_v10  ;;  %2842 = vmatprep.mubr.msk.f32.mxu0 %vm423_vm0, %v383_v11 }
  0x1a   : > { %2847 = vmatprep.subr.msk.mxu1 %vm423_vm0, %v401_v12  ;;  %2849 = vmatprep.mubr.msk.f32.mxu1 %vm423_vm0, %v385_v13 }
  0x1c   : > { %2841 = vmatpush3.xpose.msk.msra.mxu0 %vm423_vm0, %v399_v10  ;;  %2848 = vmatpush3.xpose.msk.msra.mxu1 %vm423_vm0, %v401_v12 }
  0x1d   : > { %2852 = vmatprep.subr.msk.mxu0 %vm423_vm0, %v396_v0  ;;  %2859 = vmatprep.subr.msk.mxu1 %vm423_vm0, %v398_v1 }
  0x1f   : > { %2843 = vmatmul.mubr.msk.f32.vlgmr.msra.gmra.mxu0 %vm423_vm0, %v384_v14  ;;  %2850 = vmatmul.mubr.msk.f32.vlgmr.msra.gmra.mxu1 %vm423_vm0, %v386_v15 }
  0x20   : > { %2853 = vmatpush3.xpose.msk.msra.mxu0 %vm423_vm0, %v396_v0  ;;  %2860 = vmatpush3.xpose.msk.msra.mxu1 %vm423_vm0, %v398_v1 }
  0x21   : > { %2854 = vmatprep.subr.msk.mxu0 %vm423_vm0, %v395_v2  ;;  %2856 = vmatprep.mubr.msk.f32.mxu0 %vm423_vm0, %v387_v16 }
  0x22   : > { %2861 = vmatprep.subr.msk.mxu1 %vm423_vm0, %v397_v3  ;;  %2863 = vmatprep.mubr.msk.f32.mxu1 %vm423_vm0, %v389_v17 }
  0x24   : > { %2855 = vmatpush3.xpose.msk.msra.mxu0 %vm423_vm0, %v395_v2  ;;  %2862 = vmatpush3.xpose.msk.msra.mxu1 %vm423_vm0, %v397_v3 }
  0x25   : > { %2866 = vmatprep.subr.msk.mxu0 %vm423_vm0, %v400_v6  ;;  %2873 = vmatprep.subr.msk.mxu1 %vm423_vm0, %v402_v7 }
  0x27   : > { %2857 = vmatmul.mubr.msk.f32.vlgmr.msra.gmra.mxu0 %vm423_vm0, %v388_v18  ;;  %2864 = vmatmul.mubr.msk.f32.vlgmr.msra.gmra.mxu1 %vm423_vm0, %v390_v19 }
  0x28   : > { %2867 = vmatpush3.xpose.msk.msra.mxu0 %vm423_vm0, %v400_v6  ;;  %2874 = vmatpush3.xpose.msk.msra.mxu1 %vm423_vm0, %v402_v7 }
  0x29   : > { %2868 = vmatprep.subr.msk.mxu0 %vm423_vm0, %v399_v10  ;;  %2870 = vmatprep.mubr.msk.f32.mxu0 %vm423_vm0, %v391_v20 }
  0x2a   : > { %2875 = vmatprep.subr.msk.mxu1 %vm423_vm0, %v401_v12  ;;  %2877 = vmatprep.mubr.msk.f32.mxu1 %vm423_vm0, %v393_v21 }
  0x2c   : > { %2869 = vmatpush3.xpose.msk.msra.mxu0 %vm423_vm0, %v399_v10  ;;  %2876 = vmatpush3.xpose.msk.msra.mxu1 %vm423_vm0, %v401_v12 }
  0x2f   : > { %2871 = vmatmul.mubr.msk.f32.vlgmr.msra.gmra.mxu0 %vm423_vm0, %v392_v22  ;;  %2878 = vmatmul.mubr.msk.f32.vlgmr.msra.gmra.mxu1 %vm423_vm0, %v394_v23 }
  0xd7   : > { %v2830_v24 = vpop.f32.mrf.mxu0  ;;  %v2837_v25 = vpop.f32.mrf.mxu1 }
  0xd8   : > { %v3176_v26 = vmul.f32 0.25, %v2830_v24  ;;  %v3178_v27 = vmul.f32 0.25, %v2837_v25 }
  0xd9   : > { %v502_v28 = vpop.f32.mrf.mxu0  ;;  %v589_v29 = vpop.f32.mrf.mxu1 }
  0xda   : > { %v3180_v30 = vmul.f32 0.25, %v502_v28  ;;  %v1123_v31 = vsel %vm1116_vm1, %v3178_v27, -inf  ;;  %v3184_v32 = vmul.f32 0.25, %v589_v29  ;;  %v1117_v33 = vsel %vm1116_vm1, %v3176_v26, -inf }
  0xdb   : > { %1124 = vmax.xlane.f32.xlu1 %v1123_v31  ;;  %1118 = vmax.xlane.f32.xlu0 %v1117_v33 }
  0xdc   : > { %v1120_v34 = vsel %vm1112_vm2, %v3184_v32, -inf  ;;  %v1113_v35 = vsel %vm1112_vm2, %v3180_v30, -inf }
  0xdf   : > { %1121 = vmax.xlane.f32.xlu1 %v1120_v34  ;;  %1114 = vmax.xlane.f32.xlu0 %v1113_v35  ;;  %v2844_v36 = vpop.f32.mrf.mxu0  ;;  %v2851_v37 = vpop.f32.mrf.mxu1 }
  0xe0   : > { %v3192_v38 = vmul.f32 0.25, %v2844_v36  ;;  %v3194_v39 = vmul.f32 0.25, %v2851_v37 }
  0xe1   : > { %v676_v40 = vpop.f32.mrf.mxu0  ;;  %v763_v41 = vpop.f32.mrf.mxu1 }
  0xe2   : > { %v3196_v42 = vmul.f32 0.25, %v676_v40  ;;  %v1129_v43 = vsel %vm1116_vm1, %v3192_v38, -inf  ;;  %v3200_v44 = vmul.f32 0.25, %v763_v41  ;;  %v1135_v46 = vsel %vm1116_vm1, %v3194_v39, -inf }
  0xe3   : > { %1130 = vmax.xlane.f32.xlu1 %v1129_v43 }
  0xe4   : > { %v1126_v45 = vsel %vm1112_vm2, %v3196_v42, -inf  ;;  %v1132_v47 = vsel %vm1112_vm2, %v3200_v44, -inf }
  0xe5   : > { %1127 = vmax.xlane.f32.xlu0 %v1126_v45 }
  0xe7   : > { %1136 = vmax.xlane.f32.xlu1 %v1135_v46  ;;  %v2858_v48 = vpop.f32.mrf.mxu0  ;;  %v2865_v49 = vpop.f32.mrf.mxu1 }
  0xe8   : > { %v3208_v50 = vmul.f32 0.25, %v2858_v48  ;;  %v3210_v51 = vmul.f32 0.25, %v2865_v49 }
  0xe9   : > { %v852_v52 = vpop.f32.mrf.mxu0  ;;  %1133 = vmax.xlane.f32.xlu0 %v1132_v47  ;;  %v933_v53 = vpop.f32.mrf.mxu1 }
  0xea   : > { %v3212_v54 = vmul.f32 0.25, %v852_v52  ;;  %v1205_v55 = vsel %vm1116_vm1, %v3208_v50, -inf  ;;  %v3216_v56 = vmul.f32 0.25, %v933_v53  ;;  %v1211_v58 = vsel %vm1116_vm1, %v3210_v51, -inf }
  0xeb   : > { %1206 = vmax.xlane.f32.xlu1 %v1205_v55 }
  0xec   : > { %v1202_v57 = vsel %vm1112_vm2, %v3212_v54, -inf  ;;  %v1208_v59 = vsel %vm1112_vm2, %v3216_v56, -inf }
  0xed   : > { %1203 = vmax.xlane.f32.xlu0 %v1202_v57 }
  0xef   : > { %1212 = vmax.xlane.f32.xlu1 %v1211_v58  ;;  %v2872_v60 = vpop.f32.mrf.mxu0  ;;  %v2879_v61 = vpop.f32.mrf.mxu1 }
  0xf0   : > { %v3224_v62 = vmul.f32 0.25, %v2872_v60  ;;  %v3226_v63 = vmul.f32 0.25, %v2879_v61 }
  0xf1   : > { %v1014_v0 = vpop.f32.mrf.mxu0  ;;  %1209 = vmax.xlane.f32.xlu0 %v1208_v59  ;;  %v1095_v1 = vpop.f32.mrf.mxu1 }
  0xf2   : > { %v3228_v2 = vmul.f32 0.25, %v1014_v0  ;;  %v1217_v3 = vsel %vm1116_vm1, %v3224_v62, -inf  ;;  %v3232_v4 = vmul.f32 0.25, %v1095_v1  ;;  %v1223_v6 = vsel %vm1116_vm1, %v3226_v63, -inf }
  0xf3   : > { %1218 = vmax.xlane.f32.xlu1 %v1217_v3 }
  0xf4   : > { %v1214_v5 = vsel %vm1112_vm2, %v3228_v2, -inf  ;;  %v1220_v7 = vsel %vm1112_vm2, %v3232_v4, -inf }
  0xf5   : > { %1215 = vmax.xlane.f32.xlu0 %v1214_v5 }
  0xf7   : > { %1224 = vmax.xlane.f32.xlu1 %v1223_v6 }
  0xf9   : > { %1221 = vmax.xlane.f32.xlu0 %v1220_v7 }
 0x164   : > { %v1125_v8 = vpop.xlane.xlu1 %1124  ;;  %v1119_v9 = vpop.xlane.xlu0 %1118 }
 0x165   : > { %v1141_v10 = vsub.f32 %v3178_v27, %v1125_v8  ;;  %v1139_v11 = vsub.f32 %v3176_v26, %v1119_v9 }
 0x167   : > { %v1148_v12 = vmul.f32 1.442695, %v1139_v11  ;;  %v1152_v13 = vmul.f32 1.442695, %v1141_v10 }
 0x168   : > { %v1122_v14 = vpop.xlane.xlu1 %1121  ;;  %v1115_v15 = vpop.xlane.xlu0 %1114 }
 0x169   : > { %v1140_v16 = vsub.f32 %v3184_v32, %v1122_v14  ;;  %v1138_v17 = vsub.f32 %v3180_v30, %v1115_v15  ;;  %2974 = vpow2.f32 %v1148_v12 }
 0x16a   : > { %2976 = vpow2.f32 %v1152_v13 }
 0x16b   : > { %v1146_v18 = vmul.f32 1.442695, %v1138_v17  ;;  %v1150_v19 = vmul.f32 1.442695, %v1140_v16 }
 0x16c   : > { %v1131_v20 = vpop.xlane.xlu1 %1130 }
 0x16d   : > { %v1143_v21 = vsub.f32 %v3192_v38, %v1131_v20  ;;  %2978 = vpow2.f32 %v1146_v18 }
 0x16e   : > { %v1128_v22 = vpop.xlane.xlu0 %1127  ;;  %2980 = vpow2.f32 %v1150_v19 }
 0x16f   : > { %v1156_v23 = vmul.f32 1.442695, %v1143_v21  ;;  %v1142_v24 = vsub.f32 %v3196_v42, %v1128_v22  ;;  %v404_v22 = vld [vmem:[%s3318_s12 + $0x8] sm:$0xff] }
 0x170   : > { %v1137_v25 = vpop.xlane.xlu1 %1136  ;;  %2880 = vmatprep.subr.mxu0 %v404_v22 }
 0x171   : > { %2982 = vpow2.f32 %v1156_v23  ;;  %v1154_v26 = vmul.f32 1.442695, %v1142_v24  ;;  %v1145_v27 = vsub.f32 %v3194_v39, %v1137_v25  ;;  %v403_v23 = vld [vmem:[%s3318_s12] sm:$0xff]  ;;  %v1980_v25 = vsel %vm1970_vm3, %v404_v22, 0.0  ;;  %2881 = vmatpush3.msra.mxu0 %v404_v22 }
 0x172   : > { %v1134_v28 = vpop.xlane.xlu0 %1133  ;;  %2882 = vmatprep.subr.mxu0 %v403_v23 }
 0x173   : > { %v1160_v29 = vmul.f32 1.442695, %v1145_v27  ;;  %v1144_v30 = vsub.f32 %v3200_v44, %v1134_v28  ;;  %2984 = vpow2.f32 %v1154_v26  ;;  %v1979_v26 = vsel %vm1970_vm3, %v403_v23, 0.0  ;;  %2883 = vmatpush3.msra.mxu0 %v403_v23 }
 0x174   : > { %v1207_v31 = vpop.xlane.xlu1 %1206  ;;  %v3328_v27 = vadd.f32 %v1980_v25, %v1979_v26  ;;  %v3411_v25 = vld [vmem:[%s3352_s15 + $0x20] sm:$0xff] }
 0x175   : > { %2986 = vpow2.f32 %v1160_v29  ;;  %v1158_v32 = vmul.f32 1.442695, %v1144_v30  ;;  %v1227_v33 = vsub.f32 %v3208_v50, %v1207_v31  ;;  %v406_v29 = vld [vmem:[%s3318_s12 + $0x18] sm:$0xff]  ;;  %v405_v31 = vld [vmem:[%s3318_s12 + $0x10] sm:$0xff] }
 0x176   : > { %v1204_v34 = vpop.xlane.xlu0 %1203  ;;  %v3249_v35 = vpop.eup %2974  ;;  %v1989_v30 = vsel %vm1970_vm3, %v406_v29, 0.0  ;;  %2887 = vmatprep.subr.mxu1 %v406_v29 }
 0x177   : > { %v1236_v36 = vmul.f32 1.442695, %v1227_v33  ;;  %v1226_v37 = vsub.f32 %v3212_v54, %v1204_v34  ;;  %2988 = vpow2.f32 %v1158_v32  ;;  %v1165_v39 = vsel %vm1116_vm1, %v3249_v35, 0.0  ;;  %v3254_v40 = vpop.eup %2976  ;;  %2888 = vmatpush3.msra.mxu1 %v406_v29  ;;  %v3339_v34 = vld [vmem:[%s3318_s12 + $0x28] sm:$0xff]  ;;  %v3422_v29 = vld [vmem:[%s3352_s15 + $0x30] sm:$0xff] }
 0x178   : > { %v1213_v38 = vpop.xlane.xlu1 %1212  ;;  %1166 = vadd.xlane.f32.xlu1 %v1165_v39  ;;  %v1171_v47 = vsel %vm1116_vm1, %v3254_v40, 0.0  ;;  %v1988_v32 = vsel %vm1970_vm3, %v405_v31, 0.0  ;;  %2889 = vmatprep.subr.mxu1 %v405_v31 }
 0x179   : > { %2990 = vpow2.f32 %v1236_v36  ;;  %v1234_v41 = vmul.f32 1.442695, %v1226_v37  ;;  %v1229_v42 = vsub.f32 %v3210_v51, %v1213_v38  ;;  %v3336_v33 = vadd.f32 %v1989_v30, %v1988_v32  ;;  %2890 = vmatpush3.msra.mxu1 %v405_v31  ;;  %2894 = vmatprep.subr.mxu0 %v3339_v34  ;;  %v3343_v36 = vld [vmem:[%s3318_s12 + $0x38] sm:$0xff] }
 0x17a   : > { %v1210_v43 = vpop.xlane.xlu0 %1209  ;;  %v3257_v44 = vpop.eup %2978  ;;  %2901 = vmatprep.subr.mxu1 %v3343_v36 }
 0x17b   : > { %v1240_v45 = vmul.f32 1.442695, %v1229_v42  ;;  %v1228_v46 = vsub.f32 %v3216_v56, %v1210_v43  ;;  %2992 = vpow2.f32 %v1234_v41  ;;  %v1162_v49 = vsel %vm1112_vm2, %v3257_v44, 0.0  ;;  %v3264_v50 = vpop.eup %2980 }
 0x17c   : > { %v1219_v48 = vpop.xlane.xlu1 %1218  ;;  %1172 = vadd.xlane.f32.xlu1 %v1171_v47  ;;  %1163 = vadd.xlane.f32.xlu0 %v1162_v49  ;;  %v1168_v59 = vsel %vm1112_vm2, %v3264_v50, 0.0 }
 0x17d   : > { %2994 = vpow2.f32 %v1240_v45  ;;  %v1238_v52 = vmul.f32 1.442695, %v1228_v46  ;;  %v1231_v51 = vsub.f32 %v3224_v62, %v1219_v48 }
 0x17e   : > { %v3267_v53 = vpop.eup %2982  ;;  %v1216_v54 = vpop.xlane.xlu0 %1215 }
 0x17f   : > { %v1244_v55 = vmul.f32 1.442695, %v1231_v51  ;;  %v1230_v56 = vsub.f32 %v3228_v2, %v1216_v54  ;;  %v1177_v57 = vsel %vm1116_vm1, %v3267_v53, 0.0  ;;  %2996 = vpow2.f32 %v1238_v52 }
 0x180   : > { %v1225_v58 = vpop.xlane.xlu1 %1224  ;;  %v3274_v60 = vpop.eup %2984  ;;  %1178 = vadd.xlane.f32.xlu1 %v1177_v57  ;;  %1169 = vadd.xlane.f32.xlu0 %v1168_v59  ;;  %v3356_v57 = vld [vmem:[%s3318_s12 + $0x20] sm:$0xff] }
 0x181   : > { %2998 = vpow2.f32 %v1244_v55  ;;  %v1242_v61 = vmul.f32 1.442695, %v1230_v56  ;;  %v1233_v62 = vsub.f32 %v3226_v63, %v1225_v58  ;;  %v1174_v6 = vsel %vm1112_vm2, %v3274_v60, 0.0 }
 0x182   : > { %v3277_v0 = vpop.eup %2986  ;;  %v1222_v1 = vpop.xlane.xlu0 %1221 }
 0x183   : > { %v1248_v2 = vmul.f32 1.442695, %v1233_v62  ;;  %v1232_v3 = vsub.f32 %v3232_v4, %v1222_v1  ;;  %v1183_v5 = vsel %vm1116_vm1, %v3277_v0, 0.0  ;;  %3000 = vpow2.f32 %v1242_v61  ;;  %v3362_v61 = vld [vmem:[%s3352_s15 + $0x8] sm:$0xff] }
 0x184   : > { %v3284_v7 = vpop.eup %2988  ;;  %1184 = vadd.xlane.f32.xlu1 %v1183_v5  ;;  %1175 = vadd.xlane.f32.xlu0 %v1174_v6 }
 0x185   : > { %3002 = vpow2.f32 %v1248_v2  ;;  %v1246_v8 = vmul.f32 1.442695, %v1232_v3  ;;  %v1180_v4 = vsel %vm1112_vm2, %v3284_v7, 0.0  ;;  %v3369_v2 = vld [vmem:[%s3318_s12 + $0x30] sm:$0xff] }
 0x186   : > { %v3286_v63 = vpop.eup %2990 }
 0x187   : > { %v1253_v9 = vsel %vm1116_vm1, %v3286_v63, 0.0  ;;  %3004 = vpow2.f32 %v1246_v8 }
 0x188   : > { %v3292_v10 = vpop.eup %2992  ;;  %1254 = vadd.xlane.f32.xlu1 %v1253_v9  ;;  %1181 = vadd.xlane.f32.xlu0 %v1180_v4  ;;  %v3383_v4 = vld [vmem:[%s3352_s15] sm:$0xff] }
 0x189   : > { %v1250_v13 = vsel %vm1112_vm2, %v3292_v10, 0.0 }
 0x18a   : > { %v3294_v11 = vpop.eup %2994 }
 0x18b   : > { %v1259_v12 = vsel %vm1116_vm1, %v3294_v11, 0.0 }
 0x18c   : > { %v3300_v14 = vpop.eup %2996  ;;  %1260 = vadd.xlane.f32.xlu1 %v1259_v12  ;;  %1251 = vadd.xlane.f32.xlu0 %v1250_v13  ;;  %v3390_v13 = vld [vmem:[%s3352_s15 + $0x28] sm:$0xff] }
 0x18d   : > { %v1256_v17 = vsel %vm1112_vm2, %v3300_v14, 0.0 }
 0x18e   : > { %v3302_v15 = vpop.eup %2998 }
 0x18f   : > { %v1265_v16 = vsel %vm1116_vm1, %v3302_v15, 0.0 }
 0x190   : > { %v3308_v18 = vpop.eup %3000  ;;  %1266 = vadd.xlane.f32.xlu1 %v1265_v16  ;;  %1257 = vadd.xlane.f32.xlu0 %v1256_v17 }
 0x191   : > { %v1262_v21 = vsel %vm1112_vm2, %v3308_v18, 0.0 }
 0x192   : > { %v3310_v19 = vpop.eup %3002 }
 0x193   : > { %v1271_v20 = vsel %vm1116_vm1, %v3310_v19, 0.0 }
 0x194   : > { %v3324_v24 = vpop.eup %3004  ;;  %1272 = vadd.xlane.f32.xlu1 %v1271_v20  ;;  %1263 = vadd.xlane.f32.xlu0 %v1262_v21  ;;  %v3397_v20 = vld [vmem:[%s3352_s15 + $0x10] sm:$0xff] }
 0x195   : > { %v1268_v28 = vsel %vm1112_vm2, %v3324_v24, 0.0 }
 0x198   : > { %1269 = vadd.xlane.f32.xlu0 %v1268_v28 }
 0x201   : > { %v1167_v37 = vpop.xlane.xlu1 %1166 }
 0x202   : > { %3006 = vrcp.f32 %v1167_v37 }
 0x205   : > { %v1173_v38 = vpop.xlane.xlu1 %1172  ;;  %v1164_v39 = vpop.xlane.xlu0 %1163 }
 0x206   : > { %3008 = vrcp.f32 %v1164_v39 }
 0x207   : > { %3010 = vrcp.f32 %v1173_v38 }
 0x209   : > { %v1179_v41 = vpop.xlane.xlu1 %1178  ;;  %v1170_v42 = vpop.xlane.xlu0 %1169 }
 0x20a   : > { %3012 = vrcp.f32 %v1170_v42 }
 0x20b   : > { %3014 = vrcp.f32 %v1179_v41 }
 0x20d   : > { %v1185_v43 = vpop.xlane.xlu1 %1184  ;;  %v1176_v45 = vpop.xlane.xlu0 %1175 }
 0x20e   : > { %3016 = vrcp.f32 %v1176_v45  ;;  %v3046_v45 = vmov 0.0  }
 0x20f   : > { %3018 = vrcp.f32 %v1185_v43  ;;  %v3007_v48 = vpop.eup %3006 }
 0x210   : > { %v1195_v55 = vmul.f32 %v3007_v48, %v3249_v35 }
 0x211   : > { %v1255_v46 = vpop.xlane.xlu1 %1254  ;;  %v1182_v47 = vpop.xlane.xlu0 %1181 }
 0x212   : > { %3020 = vrcp.f32 %v1182_v47 }
 0x213   : > { %v3009_v49 = vpop.eup %3008  ;;  %3022 = vrcp.f32 %v1255_v46 }
 0x214   : > { %v1194_v54 = vmul.f32 %v3009_v49, %v3257_v44  ;;  %v3011_v56 = vpop.eup %3010  ;;  %v2713_v49 = vld [vmem:[%s3450_s18 + $0x1] ss:$0 sm:$0xff] }
 0x215   : > { %v1261_v52 = vpop.xlane.xlu1 %1260  ;;  %v1252_v51 = vpop.xlane.xlu0 %1251  ;;  %v1197_v62 = vmul.f32 %v3011_v56, %v3254_v40  ;;  %v3376_v40 = vld [vmem:[%s3352_s15 + $0x18] sm:$0xff] }
 0x216   : > { %3024 = vrcp.f32 %v1252_v51  ;;  %2884 = vmatprep.mubr.msk.f32.mxu0 %vm1112_vm2, %v1194_v54 }
 0x217   : > { %v3013_v58 = vpop.eup %3012  ;;  %2885 = vmatmul.mubr.msk.f32.vlgmr.msra.gmra.mxu0 %vm1112_vm2, %v1195_v55  ;;  %3026 = vrcp.f32 %v1261_v52 }
 0x218   : > { %v1196_v35 = vmul.f32 %v3013_v58, %v3264_v50  ;;  %2895 = vmatpush3.msra.mxu0 %v3339_v34  ;;  %v3015_v1 = vpop.eup %3014 }
 0x219   : > { %v1267_v44 = vpop.xlane.xlu1 %1266  ;;  %v1258_v59 = vpop.xlane.xlu0 %1257  ;;  %2896 = vmatprep.subr.mxu0 %v3356_v57  ;;  %v1199_v8 = vmul.f32 %v3015_v1, %v3267_v53 }
 0x21a   : > { %3028 = vrcp.f32 %v1258_v59  ;;  %2891 = vmatprep.mubr.msk.f32.mxu1 %vm1112_vm2, %v1196_v35  ;;  %2897 = vmatpush3.msra.mxu0 %v3356_v57 }
 0x21b   : > { %v3017_v50 = vpop.eup %3016  ;;  %2892 = vmatmul.mubr.msk.f32.vlgmr.msra.gmra.mxu1 %vm1112_vm2, %v1197_v62  ;;  %2908 = vmatprep.subr.mxu0 %v3362_v61  ;;  %3030 = vrcp.f32 %v1267_v44 }
 0x21c   : > { %v1198_v5 = vmul.f32 %v3017_v50, %v3274_v60  ;;  %2902 = vmatpush3.msra.mxu1 %v3343_v36  ;;  %v3019_v9 = vpop.eup %3018 }
 0x21d   : > { %v1264_v3 = vpop.xlane.xlu0 %1263  ;;  %v1273_v6 = vpop.xlane.xlu1 %1272  ;;  %2903 = vmatprep.subr.mxu1 %v3369_v2  ;;  %v1201_v16 = vmul.f32 %v3019_v9, %v3277_v0  ;;  %v3404_v0 = vld [vmem:[%s3352_s15 + $0x38] sm:$0xff]  ;;  %v2030_v9 = vsel %vm1970_vm3, %v3376_v40, 0.0 }
 0x21e   : > { %3032 = vrcp.f32 %v1264_v3  ;;  %2898 = vmatprep.mubr.msk.f32.mxu0 %vm1112_vm2, %v1198_v5  ;;  %2904 = vmatpush3.msra.mxu1 %v3369_v2  ;;  %v2021_v3 = vsel %vm1970_vm3, %v3362_v61, 0.0  ;;  %v2020_v5 = vsel %vm1970_vm3, %v3383_v4, 0.0 }
 0x21f   : > { %v3021_v60 = vpop.eup %3020  ;;  %2899 = vmatmul.mubr.msk.f32.vlgmr.msra.gmra.mxu0 %vm1112_vm2, %v1199_v8  ;;  %2915 = vmatprep.subr.mxu1 %v3376_v40  ;;  %3034 = vrcp.f32 %v1273_v6  ;;  %v2714_v8 = vld [vmem:[%s3450_s18 + $0x2] ss:$0 sm:$0xff] }
 0x220   : > { %v1200_v53 = vmul.f32 %v3021_v60, %v3284_v7  ;;  %2909 = vmatpush3.msra.mxu0 %v3362_v61  ;;  %v3023_v17 = vpop.eup %3022  ;;  %v2029_v60 = vsel %vm1970_vm3, %v3397_v20, 0.0 }
 0x221   : > { %v1270_v12 = vpop.xlane.xlu0 %1269  ;;  %2910 = vmatprep.subr.mxu0 %v3383_v4  ;;  %v1283_v22 = vmul.f32 %v3023_v17, %v3286_v63  ;;  %v2715_v17 = vld [vmem:[%s3450_s18 + $0x3] ss:$0 sm:$0xff] }
 0x222   : > { %3036 = vrcp.f32 %v1270_v12  ;;  %2905 = vmatprep.mubr.msk.f32.mxu1 %vm1112_vm2, %v1200_v53  ;;  %2911 = vmatpush3.msra.mxu0 %v3383_v4  ;;  %v2022_v12 = vadd.f32 %v2021_v3, %v2020_v5  ;;  %v2031_v4 = vadd.f32 %v2030_v9, %v2029_v60 }
 0x223   : > { %v3025_v21 = vpop.eup %3024  ;;  %2906 = vmatmul.mubr.msk.f32.vlgmr.msra.gmra.mxu1 %vm1112_vm2, %v1201_v16  ;;  %2922 = vmatprep.subr.mxu0 %v3390_v13  ;;  %v2039_v16 = vsel %vm1970_vm3, %v3390_v13, 0.0 }
 0x224   : > { %v1282_v7 = vmul.f32 %v3025_v21, %v3292_v10  ;;  %2916 = vmatpush3.msra.mxu1 %v3376_v40  ;;  %v3027_v23 = vpop.eup %3026  ;;  %v2038_v40 = vsel %vm1970_vm3, %v3411_v25, 0.0 }
 0x225   : > { %2917 = vmatprep.subr.mxu1 %v3397_v20  ;;  %v1285_v63 = vmul.f32 %v3027_v23, %v3294_v11 }
 0x226   : > { %2912 = vmatprep.mubr.msk.f32.mxu0 %vm1112_vm2, %v1282_v7  ;;  %2918 = vmatpush3.msra.mxu1 %v3397_v20  ;;  %v2023_v20 = vrot.slane %v2022_v12, 4  ;;  %v2040_v7 = vadd.f32 %v2039_v16, %v2038_v40 }
 0x227   : > { %v3029_v26 = vpop.eup %3028  ;;  %2913 = vmatmul.mubr.msk.f32.vlgmr.msra.gmra.mxu0 %vm1112_vm2, %v1283_v22  ;;  %2929 = vmatprep.subr.mxu1 %v3404_v0 }
 0x228   : > { %v1284_v10 = vmul.f32 %v3029_v26, %v3300_v14  ;;  %2923 = vmatpush3.msra.mxu0 %v3390_v13  ;;  %v3031_v28 = vpop.eup %3030  ;;  %v2032_v13 = vrot.slane %v2031_v4, 4  ;;  %v2048_v26 = vsel %vm1970_vm3, %v3404_v0, 0.0 }
 0x229   : > { %2924 = vmatprep.subr.mxu0 %v3411_v25  ;;  %v1287_v32 = vmul.f32 %v3031_v28, %v3302_v15  ;;  %v2080_v15 = vlaneseq  ;;  %v2024_v28 = vadd.f32 %v2023_v20, %v2022_v12 }
 0x22a   : > { %2919 = vmatprep.mubr.msk.f32.mxu1 %vm1112_vm2, %v1284_v10  ;;  %2925 = vmatpush3.msra.mxu0 %v3411_v25  ;;  %v2047_v10 = vsel %vm1970_vm3, %v3422_v29, 0.0 }
 0x22b   : > { %v3033_v30 = vpop.eup %3032  ;;  %2920 = vmatmul.mubr.msk.f32.vlgmr.msra.gmra.mxu1 %vm1112_vm2, %v1285_v63  ;;  %v3442_v42 = vshrl.u32 %v2080_v15, 7 }
 0x22c   : > { %v1286_v31 = vmul.f32 %v3033_v30, %v3308_v18  ;;  %2930 = vmatpush3.msra.mxu1 %v3404_v0  ;;  %v3035_v14 = vpop.eup %3034  ;;  %v2041_v30 = vrot.slane %v2040_v7, 4 }
 0x22d   : > { %2931 = vmatprep.subr.mxu1 %v3422_v29  ;;  %v1289_v38 = vmul.f32 %v3035_v14, %v3310_v19  ;;  %v2712_v19 = vld [vmem:[%s3450_s18] ss:$0 sm:$0xff]  ;;  %vm2101_vm6 = vcmp.eq.s32.totalorder %v3442_v42, %v2713_v49  ;;  %v2082_v50 = vadd.s32 8, %v3442_v42  ;;  %vm2103_vm8 = vcmp.eq.s32.totalorder %v3442_v42, %v2714_v8 }
 0x22e   : > { %2926 = vmatprep.mubr.msk.f32.mxu0 %vm1112_vm2, %v1286_v31  ;;  %2932 = vmatpush3.msra.mxu1 %v3422_v29  ;;  %vm2099_vm4 = vcmp.eq.s32.totalorder %v3442_v42, %v2712_v19  ;;  %v2718_v51 = vsel %vm2101_vm6, 1.0, %v3046_v45  ;;  %v3500_v21 = vsel %vm2103_vm8, 1.0, %v3046_v45  ;;  %vm2105_vm10 = vcmp.eq.s32.totalorder %v3442_v42, %v2715_v17 }
 0x22f   : > { %v3037_v11 = vpop.eup %3036  ;;  %2927 = vmatmul.mubr.msk.f32.vlgmr.msra.gmra.mxu0 %vm1112_vm2, %v1287_v32  ;;  %v2716_v46 = vsel %vm2099_vm4, 1.0, %v3046_v45  ;;  %vm2102_vm7 = vcmp.eq.s32.totalorder %v2082_v50, %v2713_v49  ;;  %v2130_v6 = vsel %vm2123_vm5, %v2718_v51, 0.0  ;;  %vm2100_vm9 = vcmp.eq.s32.totalorder %v2082_v50, %v2712_v19 }
 0x230   : > { %v1288_v37 = vmul.f32 %v3037_v11, %v3324_v24  ;;  %2940 = vmatprep.mubr.msk.f32.mxu0 %vm2123_vm5, %v2716_v46  ;;  %v2124_v1 = vsel %vm2123_vm5, %v2716_v46, 0.0  ;;  %v3489_v53 = vsel %vm2102_vm7, 1.0, %v3046_v45  ;;  %v3503_v22 = vsel %vm2100_vm9, 1.0, %v3046_v45 }
 0x231   : > { %v2133_v61 = vsel %vm2123_vm5, %v3489_v53, 0.0  ;;  %v2136_v23 = vsel %vm2123_vm5, %v3500_v21, 0.0  ;;  %vm2104_vm11 = vcmp.eq.s32.totalorder %v2082_v50, %v2714_v8  ;;  %v2127_v25 = vsel %vm2123_vm5, %v3503_v22, 0.0 }
 0x232   : > { %2933 = vmatprep.mubr.msk.f32.mxu1 %vm1112_vm2, %v1288_v37  ;;  %v3515_v63 = vsel %vm2105_vm10, 1.0, %v3046_v45  ;;  %v3518_v31 = vsel %vm2104_vm11, 1.0, %v3046_v45  ;;  %v2033_v32 = vadd.f32 %v2032_v13, %v2031_v4  ;;  %v2049_v11 = vadd.f32 %v2048_v26, %v2047_v10 }
 0x233   : > { %2934 = vmatmul.mubr.msk.f32.vlgmr.msra.gmra.mxu1 %vm1112_vm2, %v1289_v38  ;;  %v2142_v14 = vsel %vm2123_vm5, %v3515_v63, 0.0  ;;  %vm2106_vm12 = vcmp.eq.s32.totalorder %v2082_v50, %v2715_v17  ;;  %v2139_v0 = vsel %vm2123_vm5, %v3518_v31, 0.0  ;;  %v2042_v29 = vadd.f32 %v2041_v30, %v2040_v7 }
 0x234   : > { %2947 = vmatprep.mubr.msk.f32.mxu1 %vm2123_vm5, %v2718_v51  ;;  %v3525_v37 = vsel %vm2106_vm12, 1.0, %v3046_v45  ;;  %v2050_v38 = vrot.slane %v2049_v11, 4  ;;  %v2025_v19 = vrot.slane %v2024_v28, 2  ;;  %v2034_v46 = vrot.slane %v2033_v32, 2 }
 0x235   : > { %v2145_v15 = vsel %vm2123_vm5, %v3525_v37, 0.0 }
 0x236   : > { %v2051_v49 = vadd.f32 %v2050_v38, %v2049_v11  ;;  %v2035_v51 = vadd.f32 %v2034_v46, %v2033_v32 }
 0x2d7   : > { %v3436_v18 = vpop.f32.mrf.mxu0 }
 0x2d9   : > { %v3438_v39 = vpop.f32.mrf.mxu0 }
 0x2db   : > { %v3440_v41 = vpop.f32.mrf.mxu1 }
 0x2dd   : > { %v3453_v24 = vpop.f32.mrf.mxu1 }
 0x2df   : > { %v3444_v43 = vpop.f32.mrf.mxu0 }
 0x2e1   : > { %v3457_v47 = vpop.f32.mrf.mxu0 }
 0x2e3   : > { %v3459_v48 = vpop.f32.mrf.mxu1 }
 0x2e5   : > { %v3466_v54 = vpop.f32.mrf.mxu1 }
 0x2e7   : > { %v2914_v52 = vpop.f32.mrf.mxu0 }
 0x2e8   : > { %1948 = vrot.lane.b32.xlu0 %v2914_v52, %s3047_s19  ;;  %v2026_v52 = vadd.f32 %v2025_v19, %v2024_v28 }
 0x2e9   : > { %v1686_v56 = vpop.f32.mrf.mxu0 }
 0x2eb   : > { %v2921_v55 = vpop.f32.mrf.mxu1 }
 0x2ec   : > { %1952 = vrot.lane.b32.xlu1 %v2921_v55, %s3047_s19  ;;  %v2043_v55 = vrot.slane %v2042_v29, 2 }
 0x2ed   : > { %v1767_v44 = vpop.f32.mrf.mxu1 }
 0x2ef   : > { %v2928_v58 = vpop.f32.mrf.mxu0 }
 0x2f0   : > { %1946 = vrot.lane.b32.xlu1 %v1686_v56, %s3047_s19  ;;  %1956 = vrot.lane.b32.xlu0 %v2928_v58, %s3047_s19  ;;  %v2027_v56 = vrot.slane %v2026_v52, 1  ;;  %v2036_v58 = vrot.slane %v2035_v51, 1 }
 0x2f1   : > { %v1848_v59 = vpop.f32.mrf.mxu0 }
 0x2f3   : > { %v2935_v35 = vpop.f32.mrf.mxu1 }
 0x2f4   : > { %1950 = vrot.lane.b32.xlu1 %v1767_v44, %s3047_s19  ;;  %1954 = vrot.lane.b32.xlu0 %v1848_v59, %s3047_s19  ;;  %v2044_v44 = vadd.f32 %v2043_v55, %v2042_v29  ;;  %v2052_v59 = vrot.slane %v2051_v49, 2 }
 0x2f5   : > { %v1929_v62 = vpop.f32.mrf.mxu1 }
 0x2f6   : > { %v2045_v45 = vrot.slane %v2044_v44, 1 }
 0x2f8   : > { %1960 = vrot.lane.b32.xlu1 %v2935_v35, %s3047_s19  ;;  %v2028_v35 = vadd.f32 %v2027_v56, %v2026_v52  ;;  %v2046_v5 = vadd.f32 %v2045_v45, %v2044_v44 }
 0x2fa   : > { %v2056_v50 = vmul.f32 0.0625, %v2028_v35  ;;  %v2058_v8 = vmul.f32 0.0625, %v2046_v5 }
 0x2fc   : > { %1958 = vrot.lane.b32.xlu1 %v1929_v62, %s3047_s19  ;;  %v2037_v62 = vadd.f32 %v2036_v58, %v2035_v51 }
 0x2fe   : > { %v2057_v3 = vmul.f32 0.0625, %v2037_v62 }
 0x313   : > { %2125 = vadd.xlane.f32.xlu0 %v2124_v1  ;;  %v2053_v1 = vadd.f32 %v2052_v59, %v2051_v49 }
 0x317   : > { %2131 = vadd.xlane.f32.xlu0 %v2130_v6  ;;  %v2054_v6 = vrot.slane %v2053_v1, 1 }
 0x319   : > { %v2055_v9 = vadd.f32 %v2054_v6, %v2053_v1 }
 0x31b   : > { %2134 = vadd.xlane.f32.xlu0 %v2133_v61  ;;  %v2059_v60 = vmul.f32 0.0625, %v2055_v9 }
 0x31f   : > { %2137 = vadd.xlane.f32.xlu0 %v2136_v23 }
 0x320   : > { %2128 = vadd.xlane.f32.xlu1 %v2127_v25  ;;  %v1982_v25 = vrot.slane %v3328_v27, 4 }
 0x322   : > { %v1983_v30 = vadd.f32 %v1982_v25, %v3328_v27 }
 0x323   : > { %2143 = vadd.xlane.f32.xlu0 %v2142_v14 }
 0x324   : > { %2140 = vadd.xlane.f32.xlu1 %v2139_v0  ;;  %v1984_v32 = vrot.slane %v1983_v30, 2 }
 0x328   : > { %2146 = vadd.xlane.f32.xlu1 %v2145_v15  ;;  %v1985_v15 = vadd.f32 %v1984_v32, %v1983_v30 }
 0x32a   : > { %v1986_v49 = vrot.slane %v1985_v15, 1 }
 0x32c   : > { %v1987_v56 = vadd.f32 %v1986_v49, %v1985_v15 }
 0x32e   : > { %v2016_v35 = vmul.f32 0.0625, %v1987_v56 }
 0x339   : > { %2064 = vrot.lane.b32.xlu0 %v2056_v50, %s3047_s19  ;;  %2066 = vrot.lane.b32.xlu1 %v2057_v3, %s3047_s19  ;;  %v2158_v3 = vsub.s32 0, %v3442_v42 }
 0x33d   : > { %2068 = vrot.lane.b32.xlu1 %v2058_v8, %s3047_s19 }
 0x341   : > { %2070 = vrot.lane.b32.xlu1 %v2059_v60, %s3047_s19 }
 0x35a   : > { %v1949_v12 = vpop.permute.xlu0 %1948 }
 0x35b   : > { %v1972_v61 = vsel %vm1970_vm3, %v3436_v18, %v1949_v12 }
 0x35c   : > { %2936 = vmatprep.subr.msk.mxu0 %vm2186_vm13, %v1972_v61 }
 0x35d   : > { %2937 = vmatpush3.msk.msra.mxu0 %vm2186_vm13, %v1972_v61 }
 0x35e   : > { %v1953_v4 = vpop.permute.xlu1 %1952 }
 0x35f   : > { %v1974_v16 = vsel %vm1970_vm3, %v3440_v41, %v1953_v4 }
 0x360   : > { %2943 = vmatprep.subr.msk.mxu1 %vm2186_vm13, %v1974_v16 }
 0x361   : > { %2944 = vmatpush3.msk.msra.mxu1 %vm2186_vm13, %v1974_v16 }
 0x362   : > { %v1947_v40 = vpop.permute.xlu1 %1946  ;;  %v1957_v17 = vpop.permute.xlu0 %1956 }
 0x363   : > { %v1971_v20 = vsel %vm1970_vm3, %v3438_v39, %v1947_v40  ;;  %v1976_v18 = vsel %vm1970_vm3, %v3444_v43, %v1957_v17 }
 0x364   : > { %2938 = vmatprep.subr.mxu0 %v1971_v20 }
 0x365   : > { %2939 = vmatpush3.msra.mxu0 %v1971_v20 }
 0x366   : > { %v1951_v7 = vpop.permute.xlu1 %1950  ;;  %2941 = vmatmul.mubr.msk.f32.vlgmr.msra.gmra.mxu0 %vm2123_vm5, %v3503_v22  ;;  %2950 = vmatprep.subr.msk.mxu0 %vm2186_vm13, %v1976_v18  ;;  %v1955_v41 = vpop.permute.xlu0 %1954 }
 0x367   : > { %2951 = vmatpush3.msk.msra.mxu0 %vm2186_vm13, %v1976_v18  ;;  %v1973_v23 = vsel %vm1970_vm3, %v3453_v24, %v1951_v7  ;;  %v1975_v39 = vsel %vm1970_vm3, %v3457_v47, %v1955_v41  ;;  %2954 = vmatprep.mubr.msk.f32.mxu0 %vm2123_vm5, %v3500_v21 }
 0x368   : > { %2945 = vmatprep.subr.mxu1 %v1973_v23  ;;  %2952 = vmatprep.subr.mxu0 %v1975_v39 }
 0x369   : > { %2946 = vmatpush3.msra.mxu1 %v1973_v23  ;;  %2953 = vmatpush3.msra.mxu0 %v1975_v39 }
 0x36a   : > { %2948 = vmatmul.mubr.msk.f32.vlgmr.msra.gmra.mxu1 %vm2123_vm5, %v3489_v53  ;;  %v1961_v43 = vpop.permute.xlu1 %1960  ;;  %2955 = vmatmul.mubr.msk.f32.vlgmr.msra.gmra.mxu0 %vm2123_vm5, %v3518_v31  ;;  %v1998_v53 = vsel %vm1970_vm3, %v3339_v34, 0.0  ;;  %v1991_v34 = vrot.slane %v3336_v33, 4 }
 0x36b   : > { %v1978_v24 = vsel %vm1970_vm3, %v3459_v48, %v1961_v43  ;;  %2961 = vmatprep.mubr.msk.f32.mxu1 %vm2123_vm5, %v3515_v63  ;;  %v1997_v48 = vsel %vm1970_vm3, %v3356_v57, 0.0  ;;  %v2006_v63 = vsel %vm1970_vm3, %v3369_v2, 0.0 }
 0x36c   : > { %2957 = vmatprep.subr.msk.mxu1 %vm2186_vm13, %v1978_v24  ;;  %v1999_v13 = vadd.f32 %v1998_v53, %v1997_v48  ;;  %v1992_v11 = vadd.f32 %v1991_v34, %v3336_v33 }
 0x36d   : > { %2958 = vmatpush3.msk.msra.mxu1 %vm2186_vm13, %v1978_v24 }
 0x36e   : > { %v1959_v47 = vpop.permute.xlu1 %1958  ;;  %v2000_v10 = vrot.slane %v1999_v13, 4  ;;  %v1993_v38 = vrot.slane %v1992_v11, 2 }
 0x36f   : > { %v1977_v21 = vsel %vm1970_vm3, %v3466_v54, %v1959_v47  ;;  %v2007_v54 = vsel %vm1970_vm3, %v3343_v36, 0.0 }
 0x370   : > { %2959 = vmatprep.subr.mxu1 %v1977_v21  ;;  %v2001_v31 = vadd.f32 %v2000_v10, %v1999_v13  ;;  %v2008_v57 = vadd.f32 %v2007_v54, %v2006_v63  ;;  %v1994_v27 = vadd.f32 %v1993_v38, %v1992_v11 }
 0x371   : > { %2960 = vmatpush3.msra.mxu1 %v1977_v21 }
 0x372   : > { %2962 = vmatmul.mubr.msk.f32.vlgmr.msra.gmra.mxu1 %vm2123_vm5, %v3525_v37  ;;  %v2002_v29 = vrot.slane %v2001_v31, 2  ;;  %v2009_v37 = vrot.slane %v2008_v57, 4  ;;  %v1995_v58 = vrot.slane %v1994_v27, 1 }
 0x374   : > { %v2010_v19 = vadd.f32 %v2009_v37, %v2008_v57  ;;  %v2003_v46 = vadd.f32 %v2002_v29, %v2001_v31  ;;  %v1996_v62 = vadd.f32 %v1995_v58, %v1994_v27 }
 0x376   : > { %v2011_v52 = vrot.slane %v2010_v19, 2  ;;  %v2004_v51 = vrot.slane %v2003_v46, 1  ;;  %v2017_v8 = vmul.f32 0.0625, %v1996_v62 }
 0x378   : > { %v2005_v59 = vadd.f32 %v2004_v51, %v2003_v46  ;;  %v2012_v33 = vadd.f32 %v2011_v52, %v2010_v19 }
 0x37a   : > { %v2018_v1 = vmul.f32 0.0625, %v2005_v59  ;;  %v2013_v50 = vrot.slane %v2012_v33, 1 }
 0x37c   : > { %v2014_v12 = vadd.f32 %v2013_v50, %v2012_v33 }
 0x37e   : > { %v2019_v42 = vmul.f32 0.0625, %v2014_v12 }
 0x39c   : > { %v2126_v22 = vpop.xlane.xlu0 %2125 }
 0x39d   : > { %v2148_v61 = vsub.f32 1.0, %v2126_v22 }
 0x3a0   : > { %v3574_v26 = vpop.xlane.xlu0 %2131 }
 0x3a1   : > { %v2150_v7 = vsub.f32 1.0, %v3574_v26 }
 0x3a4   : > { %v2135_v14 = vpop.xlane.xlu0 %2134 }
 0x3a5   : > { %v2151_v40 = vsub.f32 1.0, %v2135_v14 }
 0x3a8   : > { %v2138_v36 = vpop.xlane.xlu0 %2137 }
 0x3a9   : > { %v2129_v28 = vpop.xlane.xlu1 %2128  ;;  %v2152_v23 = vsub.f32 1.0, %v2138_v36 }
 0x3aa   : > { %v2149_v9 = vsub.f32 1.0, %v2129_v28 }
 0x3ac   : > { %v2144_v55 = vpop.xlane.xlu0 %2143 }
 0x3ad   : > { %v2141_v0 = vpop.xlane.xlu1 %2140  ;;  %v2154_v11 = vsub.f32 1.0, %v2144_v55 }
 0x3ae   : > { %v2153_v17 = vsub.f32 1.0, %v2141_v0 }
 0x3b0   : > { %v2065_v45 = vpop.permute.xlu0 %2064 }
 0x3b1   : > { %v3583_v2 = vpop.xlane.xlu1 %2146  ;;  %v2076_v6 = vsel %vm1970_vm3, %v2016_v35, %v2065_v45 }
 0x3b2   : > { %v2159_v4 = vrot.slane %v2076_v6, %v2158_v3  ;;  %v2155_v31 = vsub.f32 1.0, %v3583_v2 }
 0x3b4   : > { %v2173_v18 = vmul.f32 %v2159_v4, %v2149_v9  ;;  %v2172_v47 = vmul.f32 %v2159_v4, %v2148_v61 }
 0x3b5   : > { %v2067_v44 = vpop.permute.xlu1 %2066 }
 0x3b6   : > { %v2077_v16 = vsel %vm1970_vm3, %v2017_v8, %v2067_v44 }
 0x3b7   : > { %v2163_v39 = vrot.slane %v2077_v16, %v2158_v3 }
 0x3b9   : > { %v2069_v5 = vpop.permute.xlu1 %2068  ;;  %v2175_v48 = vmul.f32 %v2163_v39, %v2151_v40  ;;  %v2174_v63 = vmul.f32 %v2163_v39, %v2150_v7 }
 0x3ba   : > { %v2078_v60 = vsel %vm1970_vm3, %v2018_v1, %v2069_v5 }
 0x3bb   : > { %v2167_v20 = vrot.slane %v2078_v60, %v2158_v3 }
 0x3bd   : > { %v2071_v43 = vpop.permute.xlu1 %2070  ;;  %v2177_v22 = vmul.f32 %v2167_v20, %v2153_v17  ;;  %v2176_v28 = vmul.f32 %v2167_v20, %v2152_v23 }
 0x3be   : > { %v2079_v13 = vsel %vm1970_vm3, %v2019_v42, %v2071_v43 }
 0x3bf   : > { %v2171_v57 = vrot.slane %v2079_v13, %v2158_v3 }
 0x3c1   : > { %v2179_v0 = vmul.f32 %v2171_v57, %v2155_v31  ;;  %v2178_v38 = vmul.f32 %v2171_v57, %v2154_v11 }
 0x426   : > { %v2942_v41 = vpop.f32.mrf.mxu0 }
 0x427   : > { %v2262_v24 = vadd.f32 %v2942_v41, %v2173_v18 }
 0x428   : > { %v2256_v21 = vpop.f32.mrf.mxu0 }
 0x429   : > { %2518 = vst.msk [vmem:[%s3594_s23 + $0x8] sm:$0xff] %vm423_vm0, %v2262_v24  ;;  %v2257_v53 = vadd.f32 %v2256_v21, %v2172_v47 }
 0x42a   : > { %v2949_v25 = vpop.f32.mrf.mxu1  ;;  %v2956_v26 = vpop.f32.mrf.mxu0 }
 0x42b   : > { %2517 = vst.msk [vmem:[%s3594_s23] sm:$0xff] %vm423_vm0, %v2257_v53  ;;  %v2346_v10 = vadd.f32 %v2949_v25, %v2175_v48  ;;  %v2430_v54 = vadd.f32 %v2956_v26, %v2177_v22 }
 0x42c   : > { %v2340_v30 = vpop.f32.mrf.mxu1  ;;  %v2424_v34 = vpop.f32.mrf.mxu0 }
 0x42d   : > { %2520 = vst.msk [vmem:[%s3594_s23 + $0x18] sm:$0xff] %vm423_vm0, %v2346_v10  ;;  %v2341_v14 = vadd.f32 %v2340_v30, %v2174_v63  ;;  %v2425_v32 = vadd.f32 %v2424_v34, %v2176_v28  ;;  %2522 = vst.msk [vmem:[%s3594_s23 + $0x28] sm:$0xff] %vm423_vm0, %v2430_v54 }
 0x42f   : > { %2519 = vst.msk [vmem:[%s3594_s23 + $0x10] sm:$0xff] %vm423_vm0, %v2341_v14  ;;  %2521 = vst.msk [vmem:[%s3594_s23 + $0x20] sm:$0xff] %vm423_vm0, %v2425_v32 }
 0x432   : > { %v2963_v29 = vpop.f32.mrf.mxu1 }
 0x433   : > { %v2514_v37 = vadd.f32 %v2963_v29, %v2179_v0 }
 0x434   : > { %v2508_v15 = vpop.f32.mrf.mxu1 }
 0x435   : > { %2524 = vst.msk [vmem:[%s3594_s23 + $0x38] sm:$0xff] %vm423_vm0, %v2514_v37  ;;  %v2509_v36 = vadd.f32 %v2508_v15, %v2178_v38 }
 0x437   : > { %2523 = vst.msk [vmem:[%s3594_s23 + $0x30] sm:$0xff] %vm423_vm0, %v2509_v36 }
 0x438 PF: > { %s16_s21 = sadd.s32 1, %s3044_s21  }
 0x439   : > { %p13_p4 = scmp.ge.s32.totalorder %s16_s21, 4  }
 0x43b   :  { %15 = sbr.rel (!%p13_p4) target bundleno = 1 (0x1), region = 89 }

</bundles_post_ra>
